<compile_context>
chip_gen: v7x
topology: tpu7x:2x2x1
jax: 0.10.0
libtpu: 0.0.40
codegen_flags: <defaults>
</compile_context>

<pallas_src>
import jax
import jax.numpy as jnp
from jax.experimental import pallas as pl
from jax.experimental.pallas import tpu as pltpu

# ----------------- scaled-down model dims (BERT-like + mlp_layers=[H, M, 1]) ---
B, S, H = 2, 8, 32           # batch, sequence length, hidden size
NUM_HEADS, HEAD_DIM = 2, 16  # H = NUM_HEADS * HEAD_DIM
FFN = 64                     # transformer intermediate size
NUM_LAYERS = 2               # encoder layers
VOCAB = 64                   # synthetic vocab
P = 3                        # phrase tokens per example
M = 16                       # MLP hidden (scaled stand-in for [768, 256, 1])
AGG = "mean"                 # 'mean' (default) or 'max'
LN_EPS = 1e-12
OUT_LANES = 128              # lane-dense output slab width


def _layernorm(x, gamma, beta):
    mu = jnp.mean(x, axis=-1, keepdims=True)
    var = jnp.mean((x - mu) ** 2, axis=-1, keepdims=True)
    return (x - mu) * jax.lax.rsqrt(var + LN_EPS) * gamma + beta


# --------------------------- fused forward kernel ------------------------------
def fused_forward_kernel(idx_ref,                                     # SMEM (B*P,) int32
                         x_hbm_ref,                                   # HBM (B*S, H) f32
                         wqkv_ref, bqkv_ref, wo_ref, bo_ref,          # per-layer slabs
                         ln1g_ref, ln1b_ref,
                         w1_ref, b1_ref, w2_ref, b2_ref,
                         ln2g_ref, ln2b_ref,
                         hw1_ref, hb1_ref, hw2_ref, hb2_ref,          # head (constants)
                         out_ref,
                         x_sc, copy_sem):
    l = pl.program_id(0)

    # ---- prologue: pull the (already LayerNorm'ed) embeddings into VMEM once ----
    @pl.when(l == 0)
    def _():
        cp = pltpu.make_async_copy(x_hbm_ref, x_sc, copy_sem)
        cp.start()
        cp.wait()

    x = x_sc[...]                                                     # (B*S, H) f32

    # ---- fused QKV projection (bf16 MXU operands, f32 accumulate) ----
    # wqkv column order is head-major: [h, (q|k|v), d]
    qkv = jnp.dot(x.astype(jnp.bfloat16), wqkv_ref[...],
                  preferred_element_type=jnp.float32) + bqkv_ref[...] # (B*S, NH*3*HD)

    chunk = 3 * HEAD_DIM
    parts = [qkv[:, h * chunk:(h + 1) * chunk].reshape(B, S, chunk)
             for h in range(NUM_HEADS)]                               # 1 lane slice / head
    qkv3 = jnp.concatenate(parts, axis=0)                             # (NH*B, S, 3*HD)
    q = qkv3[:, :, :HEAD_DIM]
    k = qkv3[:, :, HEAD_DIM:2 * HEAD_DIM]
    v = qkv3[:, :, 2 * HEAD_DIM:]

    scale = 1.0 / (HEAD_DIM ** 0.5)
    # TODO(synk): at real S (512) do not materialize (NH*B, S, S); tile KV flash-style.
    scores = jnp.einsum('bqd,bkd->bqk',
                        q.astype(jnp.bfloat16), k.astype(jnp.bfloat16),
                        preferred_element_type=jnp.float32) * scale
    scores = scores - jnp.max(scores, axis=-1, keepdims=True)
    probs = jnp.exp(scores)
    probs = probs * pl.reciprocal(jnp.sum(probs, axis=-1, keepdims=True), approx=True)
    ctx = jnp.einsum('bqk,bkd->bqd',
                     probs.astype(jnp.bfloat16), v.astype(jnp.bfloat16),
                     preferred_element_type=jnp.float32)              # (NH*B, S, HD)

    # heads back along lanes (one lane concat) -> ONE output-projection matmul
    ctx2d = jnp.concatenate(
        [ctx[h * B:(h + 1) * B].reshape(B * S, HEAD_DIM) for h in range(NUM_HEADS)],
        axis=1)                                                       # (B*S, H) head-major
    attn = jnp.dot(ctx2d.astype(jnp.bfloat16), wo_ref[...],
                   preferred_element_type=jnp.float32) + bo_ref[...]
    h1 = _layernorm(x + attn, ln1g_ref[...], ln1b_ref[...])           # post-LN (BERT)

    # ---- FFN (GELU) ----
    ff = jnp.dot(h1.astype(jnp.bfloat16), w1_ref[...],
                 preferred_element_type=jnp.float32) + b1_ref[...]
    # TODO(synk): HF bert-base uses exact erf GELU; tanh approximation kept (EUP path).
    ff = jax.nn.gelu(ff, approximate=True)
    ff = jnp.dot(ff.astype(jnp.bfloat16), w2_ref[...],
                 preferred_element_type=jnp.float32) + b2_ref[...]
    y = _layernorm(h1 + ff, ln2g_ref[...], ln2b_ref[...])
    x_sc[...] = y                                                     # carry to next layer

    # ---- epilogue: phrase-row gather + MLP head (last grid step only) ----
    @pl.when(l == NUM_LAYERS - 1)
    def _():
        rows = []
        for b in range(B):
            gathered = [x_sc[pl.ds(b * S + idx_ref[b * P + pi], 1), :]  # (1, H) row gather
                        for pi in range(P)]
            acc = gathered[0]
            for g in gathered[1:]:
                if AGG == "mean":
                    acc = acc + g
                else:  # 'max'
                    acc = jnp.maximum(acc, g)
            if AGG == "mean":
                acc = acc * (1.0 / P)
            rows.append(acc)
        agg = jnp.concatenate(rows, axis=0)                            # (B, H)

        # MLP head: Linear -> ReLU -> Linear -> Sigmoid (last linear padded to 128 lanes)
        hh = jnp.maximum(
            jnp.dot(agg.astype(jnp.bfloat16), hw1_ref[...],
                    preferred_element_type=jnp.float32) + hb1_ref[...], 0.0)
        logits = jnp.dot(hh.astype(jnp.bfloat16), hw2_ref[...],
                         preferred_element_type=jnp.float32) + hb2_ref[...]
        out_ref[...] = jax.nn.sigmoid(logits)                          # (B, 128) lane-dense


def _cost_estimate(bytes_accessed):
    per_layer_mm = (2 * (B * S) * H * (3 * H)                          # qkv
                    + 2 * (NUM_HEADS * B) * S * S * HEAD_DIM * 2       # scores + ctx
                    + 2 * (B * S) * H * H                              # out proj
                    + 2 * (B * S) * H * FFN * 2)                       # ffn up + down
    flops = NUM_LAYERS * per_layer_mm + 2 * B * H * M + 2 * B * M * OUT_LANES
    trans = NUM_LAYERS * (NUM_HEADS * B * S * S + B * S * FFN) + B * OUT_LANES
    return pl.CostEstimate(flops=int(flops), transcendentals=int(trans),
                           bytes_accessed=int(bytes_accessed))


# ----------------------------------- forward ------------------------------------
def action_classifier_forward(params, tokens, phrase_token_idx):
    # Embedding-table gather + embedding LayerNorm stay in XLA (data-dependent HBM
    # gather; LN is tiny and runs once).  The kernel receives the post-LN embeddings
    # through memory_space=pl.ANY and DMAs them into scratch only at layer 0.
    # TODO(synk): real BERT also adds token_type embeddings and an attention padding
    # mask; omitted for this synthetic, fully-dense backbone.
    x = params['word_emb'][tokens] + params['pos_emb'][None, :, :]    # (B, S, H)
    x = x.reshape(B * S, H)
    mu = jnp.mean(x, axis=-1, keepdims=True)
    var = jnp.mean((x - mu) ** 2, axis=-1, keepdims=True)
    x = (x - mu) * jax.lax.rsqrt(var + LN_EPS) * params['emb_ln_g'] + params['emb_ln_b']
    idx_flat = phrase_token_idx.reshape(B * P).astype(jnp.int32)

    layer_keys = ('wqkv', 'bqkv', 'wo', 'bo', 'ln1_g', 'ln1_b',
                  'w1', 'b1', 'w2', 'b2', 'ln2_g', 'ln2_b')
    head_keys = ('head_w1', 'head_b1', 'head_w2', 'head_b2')
    args = (x,) + tuple(params[k] for k in layer_keys) + tuple(params[k] for k in head_keys)

    def const_spec(a):                        # whole array, resident across the grid
        zeros = (0,) * a.ndim
        return pl.BlockSpec(a.shape, lambda l, idx, z=zeros: z)

    def layer_spec(a):                        # stacked (NUM_LAYERS, r, c) -> (r, c) slab
        # TODO(synk): v6e (128 MiB VMEM) can add pipeline_mode=pl.Buffered(3) on the big
        # slabs; v7x (64 MiB) should keep depth 2 and add an FFN K-tiling grid axis instead.
        return pl.BlockSpec((pl.Squeezed(),) + a.shape[1:], lambda l, idx: (l, 0, 0))

    in_specs = [pl.BlockSpec(memory_space=pl.ANY)]      # x stays in HBM; DMA'd at l==0 only
    in_specs += [layer_spec(params[k]) for k in layer_keys]
    in_specs += [const_spec(params[k]) for k in head_keys]

    bytes_accessed = sum(int(a.size) * a.dtype.itemsize for a in args)
    bytes_accessed += B * P * 4 + B * OUT_LANES * 4

    out = pl.pallas_call(
        fused_forward_kernel,
        out_shape=jax.ShapeDtypeStruct((B, OUT_LANES), jnp.float32),
        grid_spec=pltpu.PrefetchScalarGridSpec(
            num_scalar_prefetch=1,
            grid=(NUM_LAYERS,),
            in_specs=in_specs,
            out_specs=pl.BlockSpec((B, OUT_LANES), lambda l, idx: (0, 0)),
            scratch_shapes=[pltpu.VMEM((B * S, H), jnp.float32),
                            pltpu.SemaphoreType.DMA]),
        compiler_params=pltpu.CompilerParams(
            # Layers are sequential (activation carry).
            # TODO(synk): v7x — leading "parallel" batch-block axis for the 2nd TensorCore.
            dimension_semantics=("arbitrary",),
            vmem_limit_bytes=64 * 1024 * 1024),
        cost_estimate=_cost_estimate(bytes_accessed),
    )(idx_flat, *args)

    return out[:, :1]                                                 # (B, 1) scores in (0, 1)


# ----------------------------------- parameters ---------------------------------
def init_params(key):
    keys = iter(jax.random.split(key, 32))

    def rnd(shape, dtype=jnp.bfloat16, scale=0.02):
        return (scale * jax.random.normal(next(keys), shape, jnp.float32)).astype(dtype)

    def rnd_stack(shape):                      # bf16 stacked MXU weights
        return jnp.stack([rnd(shape) for _ in range(NUM_LAYERS)])

    head_w2 = rnd((M, 1))
    head_b2 = jnp.zeros((1, 1), jnp.float32)

    return dict(
        word_emb=rnd((VOCAB, H), jnp.float32),
        pos_emb=rnd((S, H), jnp.float32),
        emb_ln_g=jnp.ones((1, H), jnp.float32),
        emb_ln_b=jnp.zeros((1, H), jnp.float32),
        # stacked per-layer encoder weights (leading axis = Pallas grid axis), bf16.
        # wqkv columns / wo rows are head-major [h, (q|k|v), d]; permute a real BERT
        # checkpoint accordingly when porting.
        wqkv=rnd_stack((H, 3 * H)),
        bqkv=jnp.zeros((NUM_LAYERS, 1, 3 * H), jnp.float32),
        wo=rnd_stack((H, H)),
        bo=jnp.zeros((NUM_LAYERS, 1, H), jnp.float32),
        ln1_g=jnp.ones((NUM_LAYERS, 1, H), jnp.float32),
        ln1_b=jnp.zeros((NUM_LAYERS, 1, H), jnp.float32),
        w1=rnd_stack((H, FFN)),
        b1=jnp.zeros((NUM_LAYERS, 1, FFN), jnp.float32),
        w2=rnd_stack((FFN, H)),
        b2=jnp.zeros((NUM_LAYERS, 1, H), jnp.float32),
        ln2_g=jnp.ones((NUM_LAYERS, 1, H), jnp.float32),
        ln2_b=jnp.zeros((NUM_LAYERS, 1, H), jnp.float32),
        # MLP head [H, M, 1]; last linear padded to a lane-dense (M, 128) column slab
        head_w1=rnd((H, M)),
        head_b1=jnp.zeros((1, M), jnp.float32),
        head_w2=jnp.pad(head_w2, ((0, 0), (0, OUT_LANES - 1))),
        head_b2=jnp.pad(head_b2, ((0, 0), (0, OUT_LANES - 1))),
    )


if __name__ == "__main__":
    key = jax.random.PRNGKey(0)
    pkey, tkey, ikey = jax.random.split(key, 3)

    params = init_params(pkey)
    tokens = jax.random.randint(tkey, (B, S), 0, VOCAB, dtype=jnp.int32)
    phrase_token_idx = jax.random.randint(ikey, (B, P), 0, S, dtype=jnp.int32)

    fwd = jax.jit(action_classifier_forward)
    scores = fwd(params, tokens, phrase_token_idx)
    jax.block_until_ready(scores)

    assert scores.shape == (B, 1) and scores.dtype == jnp.float32
    assert bool(jnp.all((scores > 0.0) & (scores < 1.0)))
    print("KERNEL_OK")
</pallas_src>

<mosaic_0001>
module attributes {stable_mosaic.version = 11 : i64} {
  func.func @fused_forward_kernel(%arg0: i32, %arg1: memref<6xi32, #tpu.memory_space<smem>>, %arg2: memref<16x32xf32, #tpu.memory_space<any>>, %arg3: memref<1x32x96xbf16, #tpu.memory_space<vmem>>, %arg4: memref<1x1x96xf32, #tpu.memory_space<vmem>>, %arg5: memref<1x32x32xbf16, #tpu.memory_space<vmem>>, %arg6: memref<1x1x32xf32, #tpu.memory_space<vmem>>, %arg7: memref<1x1x32xf32, #tpu.memory_space<vmem>>, %arg8: memref<1x1x32xf32, #tpu.memory_space<vmem>>, %arg9: memref<1x32x64xbf16, #tpu.memory_space<vmem>>, %arg10: memref<1x1x64xf32, #tpu.memory_space<vmem>>, %arg11: memref<1x64x32xbf16, #tpu.memory_space<vmem>>, %arg12: memref<1x1x32xf32, #tpu.memory_space<vmem>>, %arg13: memref<1x1x32xf32, #tpu.memory_space<vmem>>, %arg14: memref<1x1x32xf32, #tpu.memory_space<vmem>>, %arg15: memref<32x16xbf16, #tpu.memory_space<vmem>>, %arg16: memref<1x16xf32, #tpu.memory_space<vmem>>, %arg17: memref<16x128xbf16, #tpu.memory_space<vmem>>, %arg18: memref<1x128xf32, #tpu.memory_space<vmem>>, %arg19: memref<2x128xf32, #tpu.memory_space<vmem>>, %arg20: memref<16x32xf32, #tpu.memory_space<vmem>>, %arg21: memref<!tpu.dma_semaphore, #tpu.memory_space<semaphore_mem>>) attributes {dimension_semantics = [#tpu.dimension_semantics<arbitrary>], iteration_bounds = array<i64: 2>, scalar_prefetch = 1 : i64, scratch_operands = 2 : i64, tpu.core_type = #tpu.core_type<tc>, window_params = [{}, {transform_indices = @transform_1, window_bounds = array<i64: 1, 32, 96>}, {transform_indices = @transform_2, window_bounds = array<i64: 1, 1, 96>}, {transform_indices = @transform_3, window_bounds = array<i64: 1, 32, 32>}, {transform_indices = @transform_4, window_bounds = array<i64: 1, 1, 32>}, {transform_indices = @transform_5, window_bounds = array<i64: 1, 1, 32>}, {transform_indices = @transform_6, window_bounds = array<i64: 1, 1, 32>}, {transform_indices = @transform_7, window_bounds = array<i64: 1, 32, 64>}, {transform_indices = @transform_8, window_bounds = array<i64: 1, 1, 64>}, {transform_indices = @transform_9, window_bounds = array<i64: 1, 64, 32>}, {transform_indices = @transform_10, window_bounds = array<i64: 1, 1, 32>}, {transform_indices = @transform_11, window_bounds = array<i64: 1, 1, 32>}, {transform_indices = @transform_12, window_bounds = array<i64: 1, 1, 32>}, {pipeline_mode = #tpu.pipeline_mode<synchronous>, transform_indices = @transform_13, window_bounds = array<i64: 32, 16>}, {pipeline_mode = #tpu.pipeline_mode<synchronous>, transform_indices = @transform_14, window_bounds = array<i64: 1, 16>}, {pipeline_mode = #tpu.pipeline_mode<synchronous>, transform_indices = @transform_15, window_bounds = array<i64: 16, 128>}, {pipeline_mode = #tpu.pipeline_mode<synchronous>, transform_indices = @transform_16, window_bounds = array<i64: 1, 128>}, {pipeline_mode = #tpu.pipeline_mode<synchronous>, transform_indices = @transform_17, window_bounds = array<i64: 2, 128>}]} {
    %c0_i32 = arith.constant 0 : i32
    %0 = arith.cmpi eq, %arg0, %c0_i32 : i32
    %1 = arith.extui %0 : i1 to i32
    %c0_i32_0 = arith.constant 0 : i32
    %2 = arith.cmpi ne, %1, %c0_i32_0 : i32
    scf.if %2 {
      tpu.enqueue_dma source(%arg2 : memref<16x32xf32, #tpu.memory_space<any>>) target(%arg20 : memref<16x32xf32, #tpu.memory_space<vmem>>) target_semaphore(%arg21 : memref<!tpu.dma_semaphore, #tpu.memory_space<semaphore_mem>>)
      tpu.wait_dma2 semaphore(%arg21 : memref<!tpu.dma_semaphore, #tpu.memory_space<semaphore_mem>>) src(%arg2 : memref<16x32xf32, #tpu.memory_space<any>>) dst(%arg20 : memref<16x32xf32, #tpu.memory_space<vmem>>)
    } else {
    }
    %c0 = arith.constant 0 : index
    %c0_1 = arith.constant 0 : index
    %3 = vector.load %arg20[%c0, %c0_1] : memref<16x32xf32, #tpu.memory_space<vmem>>, vector<16x32xf32>
    %4 = arith.truncf %3 : vector<16x32xf32> to vector<16x32xbf16>
    %c0_2 = arith.constant 0 : index
    %c0_3 = arith.constant 0 : index
    %c0_4 = arith.constant 0 : index
    %5 = vector.load %arg3[%c0_2, %c0_3, %c0_4] : memref<1x32x96xbf16, #tpu.memory_space<vmem>>, vector<1x32x96xbf16>
    %6 = vector.shape_cast %5 : vector<1x32x96xbf16> to vector<32x96xbf16>
    %cst = arith.constant dense<0.000000e+00> : vector<16x96xf32>
    %7 = tpu.matmul %4, %6, %cst {dimension_numbers = #tpu.dot_dimension_numbers<[1], [0], [0], [1], [0, 0, 1, 1], [], []>} : vector<16x32xbf16>, vector<32x96xbf16>, vector<16x96xf32> -> vector<16x96xf32>
    %c0_5 = arith.constant 0 : index
    %c0_6 = arith.constant 0 : index
    %c0_7 = arith.constant 0 : index
    %8 = vector.load %arg4[%c0_5, %c0_6, %c0_7] : memref<1x1x96xf32, #tpu.memory_space<vmem>>, vector<1x1x96xf32>
    %9 = vector.shape_cast %8 : vector<1x1x96xf32> to vector<1x96xf32>
    %10 = vector.broadcast %9 : vector<1x96xf32> to vector<16x96xf32>
    %11 = arith.addf %7, %10 : vector<16x96xf32>
    %12 = vector.extract_strided_slice %11 {offsets = [0, 0], sizes = [16, 48], strides = [1, 1]} : vector<16x96xf32> to vector<16x48xf32>
    %13 = vector.shape_cast %12 : vector<16x48xf32> to vector<2x8x48xf32>
    %14 = vector.extract_strided_slice %11 {offsets = [0, 48], sizes = [16, 48], strides = [1, 1]} : vector<16x96xf32> to vector<16x48xf32>
    %15 = vector.shape_cast %14 : vector<16x48xf32> to vector<2x8x48xf32>
    %16 = tpu.concatenate %13, %15 in 0 : vector<2x8x48xf32>, vector<2x8x48xf32> -> vector<4x8x48xf32>
    %17 = vector.extract_strided_slice %16 {offsets = [0, 0, 0], sizes = [4, 8, 16], strides = [1, 1, 1]} : vector<4x8x48xf32> to vector<4x8x16xf32>
    %18 = vector.extract_strided_slice %16 {offsets = [0, 0, 16], sizes = [4, 8, 16], strides = [1, 1, 1]} : vector<4x8x48xf32> to vector<4x8x16xf32>
    %19 = vector.extract_strided_slice %16 {offsets = [0, 0, 32], sizes = [4, 8, 16], strides = [1, 1, 1]} : vector<4x8x48xf32> to vector<4x8x16xf32>
    %20 = arith.truncf %17 : vector<4x8x16xf32> to vector<4x8x16xbf16>
    %21 = arith.truncf %18 : vector<4x8x16xf32> to vector<4x8x16xbf16>
    "tpu.trace_start"() <{level = 10 : i32, message = "bqd,bkd->bqk"}> : () -> ()
    %cst_8 = arith.constant dense<0.000000e+00> : vector<4x8x8xf32>
    %22 = tpu.matmul %20, %21, %cst_8 {dimension_numbers = #tpu.dot_dimension_numbers<[2], [2], [1], [1], [0, 0, 0, 1, 1, 1], [0], [0]>} : vector<4x8x16xbf16>, vector<4x8x16xbf16>, vector<4x8x8xf32> -> vector<4x8x8xf32>
    "tpu.trace_stop"() : () -> ()
    %cst_9 = arith.constant 2.500000e-01 : f32
    %23 = vector.broadcast %cst_9 : f32 to vector<4x8x8xf32>
    %24 = arith.mulf %22, %23 : vector<4x8x8xf32>
    %cst_10 = arith.constant dense<0xFF800000> : vector<4x8xf32>
    %25 = vector.multi_reduction <maximumf>, %24, %cst_10 [2] : vector<4x8x8xf32> to vector<4x8xf32>
    %26 = vector.shape_cast %25 : vector<4x8xf32> to vector<4x8x1xf32>
    %27 = vector.broadcast %26 : vector<4x8x1xf32> to vector<4x8x8xf32>
    %28 = arith.subf %24, %27 : vector<4x8x8xf32>
    %29 = math.exp %28 : vector<4x8x8xf32>
    %cst_11 = arith.constant dense<0.000000e+00> : vector<4x8xf32>
    %30 = vector.multi_reduction <add>, %29, %cst_11 [2] : vector<4x8x8xf32> to vector<4x8xf32>
    %31 = vector.shape_cast %30 : vector<4x8xf32> to vector<4x8x1xf32>
    %32 = tpu.reciprocal %31 {approx = true} : vector<4x8x1xf32> -> vector<4x8x1xf32>
    %33 = vector.broadcast %32 : vector<4x8x1xf32> to vector<4x8x8xf32>
    %34 = arith.mulf %29, %33 : vector<4x8x8xf32>
    %35 = arith.truncf %34 : vector<4x8x8xf32> to vector<4x8x8xbf16>
    %36 = arith.truncf %19 : vector<4x8x16xf32> to vector<4x8x16xbf16>
    "tpu.trace_start"() <{level = 10 : i32, message = "bqk,bkd->bqd"}> : () -> ()
    %cst_12 = arith.constant dense<0.000000e+00> : vector<4x8x16xf32>
    %37 = tpu.matmul %35, %36, %cst_12 {dimension_numbers = #tpu.dot_dimension_numbers<[2], [1], [1], [2], [0, 0, 0, 1, 1, 2], [0], [0]>} : vector<4x8x8xbf16>, vector<4x8x16xbf16>, vector<4x8x16xf32> -> vector<4x8x16xf32>
    "tpu.trace_stop"() : () -> ()
    %38 = vector.extract_strided_slice %37 {offsets = [0, 0, 0], sizes = [2, 8, 16], strides = [1, 1, 1]} : vector<4x8x16xf32> to vector<2x8x16xf32>
    %39 = vector.shape_cast %38 : vector<2x8x16xf32> to vector<16x16xf32>
    %40 = vector.extract_strided_slice %37 {offsets = [2, 0, 0], sizes = [2, 8, 16], strides = [1, 1, 1]} : vector<4x8x16xf32> to vector<2x8x16xf32>
    %41 = vector.shape_cast %40 : vector<2x8x16xf32> to vector<16x16xf32>
    %42 = tpu.concatenate %39, %41 in 1 : vector<16x16xf32>, vector<16x16xf32> -> vector<16x32xf32>
    %43 = arith.truncf %42 : vector<16x32xf32> to vector<16x32xbf16>
    %c0_13 = arith.constant 0 : index
    %c0_14 = arith.constant 0 : index
    %c0_15 = arith.constant 0 : index
    %44 = vector.load %arg5[%c0_13, %c0_14, %c0_15] : memref<1x32x32xbf16, #tpu.memory_space<vmem>>, vector<1x32x32xbf16>
    %45 = vector.shape_cast %44 : vector<1x32x32xbf16> to vector<32x32xbf16>
    %cst_16 = arith.constant dense<0.000000e+00> : vector<16x32xf32>
    %46 = tpu.matmul %43, %45, %cst_16 {dimension_numbers = #tpu.dot_dimension_numbers<[1], [0], [0], [1], [0, 0, 1, 1], [], []>} : vector<16x32xbf16>, vector<32x32xbf16>, vector<16x32xf32> -> vector<16x32xf32>
    %c0_17 = arith.constant 0 : index
    %c0_18 = arith.constant 0 : index
    %c0_19 = arith.constant 0 : index
    %47 = vector.load %arg6[%c0_17, %c0_18, %c0_19] : memref<1x1x32xf32, #tpu.memory_space<vmem>>, vector<1x1x32xf32>
    %48 = vector.shape_cast %47 : vector<1x1x32xf32> to vector<1x32xf32>
    %49 = vector.broadcast %48 : vector<1x32xf32> to vector<16x32xf32>
    %50 = arith.addf %46, %49 : vector<16x32xf32>
    %51 = arith.addf %3, %50 : vector<16x32xf32>
    %c0_20 = arith.constant 0 : index
    %c0_21 = arith.constant 0 : index
    %c0_22 = arith.constant 0 : index
    %52 = vector.load %arg7[%c0_20, %c0_21, %c0_22] : memref<1x1x32xf32, #tpu.memory_space<vmem>>, vector<1x1x32xf32>
    %53 = vector.shape_cast %52 : vector<1x1x32xf32> to vector<1x32xf32>
    %c0_23 = arith.constant 0 : index
    %c0_24 = arith.constant 0 : index
    %c0_25 = arith.constant 0 : index
    %54 = vector.load %arg8[%c0_23, %c0_24, %c0_25] : memref<1x1x32xf32, #tpu.memory_space<vmem>>, vector<1x1x32xf32>
    %55 = vector.shape_cast %54 : vector<1x1x32xf32> to vector<1x32xf32>
    %cst_26 = arith.constant dense<0.000000e+00> : vector<16xf32>
    %56 = vector.multi_reduction <add>, %51, %cst_26 [1] : vector<16x32xf32> to vector<16xf32>
    %57 = vector.shape_cast %56 : vector<16xf32> to vector<16x1xf32>
    %cst_27 = arith.constant 3.200000e+01 : f32
    %58 = vector.broadcast %cst_27 : f32 to vector<16x1xf32>
    %59 = arith.divf %57, %58 : vector<16x1xf32>
    %60 = vector.broadcast %59 : vector<16x1xf32> to vector<16x32xf32>
    %61 = arith.subf %51, %60 : vector<16x32xf32>
    %62 = arith.mulf %61, %61 : vector<16x32xf32>
    %cst_28 = arith.constant dense<0.000000e+00> : vector<16xf32>
    %63 = vector.multi_reduction <add>, %62, %cst_28 [1] : vector<16x32xf32> to vector<16xf32>
    %64 = vector.shape_cast %63 : vector<16xf32> to vector<16x1xf32>
    %cst_29 = arith.constant 3.200000e+01 : f32
    %65 = vector.broadcast %cst_29 : f32 to vector<16x1xf32>
    %66 = arith.divf %64, %65 : vector<16x1xf32>
    %67 = vector.broadcast %59 : vector<16x1xf32> to vector<16x32xf32>
    %68 = arith.subf %51, %67 : vector<16x32xf32>
    %cst_30 = arith.constant 9.99999996E-13 : f32
    %69 = vector.broadcast %cst_30 : f32 to vector<16x1xf32>
    %70 = arith.addf %66, %69 : vector<16x1xf32>
    %71 = math.rsqrt %70 : vector<16x1xf32>
    %72 = vector.broadcast %71 : vector<16x1xf32> to vector<16x32xf32>
    %73 = arith.mulf %68, %72 : vector<16x32xf32>
    %74 = vector.broadcast %53 : vector<1x32xf32> to vector<16x32xf32>
    %75 = arith.mulf %73, %74 : vector<16x32xf32>
    %76 = vector.broadcast %55 : vector<1x32xf32> to vector<16x32xf32>
    %77 = arith.addf %75, %76 : vector<16x32xf32>
    %78 = arith.truncf %77 : vector<16x32xf32> to vector<16x32xbf16>
    %c0_31 = arith.constant 0 : index
    %c0_32 = arith.constant 0 : index
    %c0_33 = arith.constant 0 : index
    %79 = vector.load %arg9[%c0_31, %c0_32, %c0_33] : memref<1x32x64xbf16, #tpu.memory_space<vmem>>, vector<1x32x64xbf16>
    %80 = vector.shape_cast %79 : vector<1x32x64xbf16> to vector<32x64xbf16>
    %cst_34 = arith.constant dense<0.000000e+00> : vector<16x64xf32>
    %81 = tpu.matmul %78, %80, %cst_34 {dimension_numbers = #tpu.dot_dimension_numbers<[1], [0], [0], [1], [0, 0, 1, 1], [], []>} : vector<16x32xbf16>, vector<32x64xbf16>, vector<16x64xf32> -> vector<16x64xf32>
    %c0_35 = arith.constant 0 : index
    %c0_36 = arith.constant 0 : index
    %c0_37 = arith.constant 0 : index
    %82 = vector.load %arg10[%c0_35, %c0_36, %c0_37] : memref<1x1x64xf32, #tpu.memory_space<vmem>>, vector<1x1x64xf32>
    %83 = vector.shape_cast %82 : vector<1x1x64xf32> to vector<1x64xf32>
    %84 = vector.broadcast %83 : vector<1x64xf32> to vector<16x64xf32>
    %85 = arith.addf %81, %84 : vector<16x64xf32>
    %86 = arith.mulf %85, %85 : vector<16x64xf32>
    %87 = arith.mulf %85, %86 : vector<16x64xf32>
    %cst_38 = arith.constant 4.471500e-02 : f32
    %88 = vector.broadcast %cst_38 : f32 to vector<16x64xf32>
    %89 = arith.mulf %88, %87 : vector<16x64xf32>
    %90 = arith.addf %85, %89 : vector<16x64xf32>
    %cst_39 = arith.constant 0.797884583 : f32
    %91 = vector.broadcast %cst_39 : f32 to vector<16x64xf32>
    %92 = arith.mulf %91, %90 : vector<16x64xf32>
    %93 = math.tanh %92 : vector<16x64xf32>
    %cst_40 = arith.constant 1.000000e+00 : f32
    %94 = vector.broadcast %cst_40 : f32 to vector<16x64xf32>
    %95 = arith.addf %94, %93 : vector<16x64xf32>
    %cst_41 = arith.constant 5.000000e-01 : f32
    %96 = vector.broadcast %cst_41 : f32 to vector<16x64xf32>
    %97 = arith.mulf %96, %95 : vector<16x64xf32>
    %98 = arith.mulf %85, %97 : vector<16x64xf32>
    %99 = arith.truncf %98 : vector<16x64xf32> to vector<16x64xbf16>
    %c0_42 = arith.constant 0 : index
    %c0_43 = arith.constant 0 : index
    %c0_44 = arith.constant 0 : index
    %100 = vector.load %arg11[%c0_42, %c0_43, %c0_44] : memref<1x64x32xbf16, #tpu.memory_space<vmem>>, vector<1x64x32xbf16>
    %101 = vector.shape_cast %100 : vector<1x64x32xbf16> to vector<64x32xbf16>
    %cst_45 = arith.constant dense<0.000000e+00> : vector<16x32xf32>
    %102 = tpu.matmul %99, %101, %cst_45 {dimension_numbers = #tpu.dot_dimension_numbers<[1], [0], [0], [1], [0, 0, 1, 1], [], []>} : vector<16x64xbf16>, vector<64x32xbf16>, vector<16x32xf32> -> vector<16x32xf32>
    %c0_46 = arith.constant 0 : index
    %c0_47 = arith.constant 0 : index
    %c0_48 = arith.constant 0 : index
    %103 = vector.load %arg12[%c0_46, %c0_47, %c0_48] : memref<1x1x32xf32, #tpu.memory_space<vmem>>, vector<1x1x32xf32>
    %104 = vector.shape_cast %103 : vector<1x1x32xf32> to vector<1x32xf32>
    %105 = vector.broadcast %104 : vector<1x32xf32> to vector<16x32xf32>
    %106 = arith.addf %102, %105 : vector<16x32xf32>
    %107 = arith.addf %77, %106 : vector<16x32xf32>
    %c0_49 = arith.constant 0 : index
    %c0_50 = arith.constant 0 : index
    %c0_51 = arith.constant 0 : index
    %108 = vector.load %arg13[%c0_49, %c0_50, %c0_51] : memref<1x1x32xf32, #tpu.memory_space<vmem>>, vector<1x1x32xf32>
    %109 = vector.shape_cast %108 : vector<1x1x32xf32> to vector<1x32xf32>
    %c0_52 = arith.constant 0 : index
    %c0_53 = arith.constant 0 : index
    %c0_54 = arith.constant 0 : index
    %110 = vector.load %arg14[%c0_52, %c0_53, %c0_54] : memref<1x1x32xf32, #tpu.memory_space<vmem>>, vector<1x1x32xf32>
    %111 = vector.shape_cast %110 : vector<1x1x32xf32> to vector<1x32xf32>
    %cst_55 = arith.constant dense<0.000000e+00> : vector<16xf32>
    %112 = vector.multi_reduction <add>, %107, %cst_55 [1] : vector<16x32xf32> to vector<16xf32>
    %113 = vector.shape_cast %112 : vector<16xf32> to vector<16x1xf32>
    %cst_56 = arith.constant 3.200000e+01 : f32
    %114 = vector.broadcast %cst_56 : f32 to vector<16x1xf32>
    %115 = arith.divf %113, %114 : vector<16x1xf32>
    %116 = vector.broadcast %115 : vector<16x1xf32> to vector<16x32xf32>
    %117 = arith.subf %107, %116 : vector<16x32xf32>
    %118 = arith.mulf %117, %117 : vector<16x32xf32>
    %cst_57 = arith.constant dense<0.000000e+00> : vector<16xf32>
    %119 = vector.multi_reduction <add>, %118, %cst_57 [1] : vector<16x32xf32> to vector<16xf32>
    %120 = vector.shape_cast %119 : vector<16xf32> to vector<16x1xf32>
    %cst_58 = arith.constant 3.200000e+01 : f32
    %121 = vector.broadcast %cst_58 : f32 to vector<16x1xf32>
    %122 = arith.divf %120, %121 : vector<16x1xf32>
    %123 = vector.broadcast %115 : vector<16x1xf32> to vector<16x32xf32>
    %124 = arith.subf %107, %123 : vector<16x32xf32>
    %cst_59 = arith.constant 9.99999996E-13 : f32
    %125 = vector.broadcast %cst_59 : f32 to vector<16x1xf32>
    %126 = arith.addf %122, %125 : vector<16x1xf32>
    %127 = math.rsqrt %126 : vector<16x1xf32>
    %128 = vector.broadcast %127 : vector<16x1xf32> to vector<16x32xf32>
    %129 = arith.mulf %124, %128 : vector<16x32xf32>
    %130 = vector.broadcast %109 : vector<1x32xf32> to vector<16x32xf32>
    %131 = arith.mulf %129, %130 : vector<16x32xf32>
    %132 = vector.broadcast %111 : vector<1x32xf32> to vector<16x32xf32>
    %133 = arith.addf %131, %132 : vector<16x32xf32>
    %c0_60 = arith.constant 0 : index
    %c0_61 = arith.constant 0 : index
    %134 = vector.load %arg20[%c0_60, %c0_61] : memref<16x32xf32, #tpu.memory_space<vmem>>, vector<16x32xf32>
    tpu.vector_store %arg20[%c0_60, %c0_61], %133 {strides = array<i32>} : memref<16x32xf32, #tpu.memory_space<vmem>>, vector<16x32xf32>,
    %c1_i32 = arith.constant 1 : i32
    %135 = arith.cmpi eq, %arg0, %c1_i32 : i32
    %136 = arith.extui %135 : i1 to i32
    %c0_i32_62 = arith.constant 0 : i32
    %137 = arith.cmpi ne, %136, %c0_i32_62 : i32
    scf.if %137 {
      %c0_63 = arith.constant 0 : index
      %138 = memref.load %arg1[%c0_63] : memref<6xi32, #tpu.memory_space<smem>>
      %c0_i32_64 = arith.constant 0 : i32
      %139 = arith.addi %c0_i32_64, %138 : i32
      %140 = arith.index_cast %139 : i32 to index
      %c0_65 = arith.constant 0 : index
      %141 = vector.load %arg20[%140, %c0_65] : memref<16x32xf32, #tpu.memory_space<vmem>>, vector<1x32xf32>
      %c1 = arith.constant 1 : index
      %142 = memref.load %arg1[%c1] : memref<6xi32, #tpu.memory_space<smem>>
      %c0_i32_66 = arith.constant 0 : i32
      %143 = arith.addi %c0_i32_66, %142 : i32
      %144 = arith.index_cast %143 : i32 to index
      %c0_67 = arith.constant 0 : index
      %145 = vector.load %arg20[%144, %c0_67] : memref<16x32xf32, #tpu.memory_space<vmem>>, vector<1x32xf32>
      %c2 = arith.constant 2 : index
      %146 = memref.load %arg1[%c2] : memref<6xi32, #tpu.memory_space<smem>>
      %c0_i32_68 = arith.constant 0 : i32
      %147 = arith.addi %c0_i32_68, %146 : i32
      %148 = arith.index_cast %147 : i32 to index
      %c0_69 = arith.constant 0 : index
      %149 = vector.load %arg20[%148, %c0_69] : memref<16x32xf32, #tpu.memory_space<vmem>>, vector<1x32xf32>
      %150 = arith.addf %141, %145 : vector<1x32xf32>
      %151 = arith.addf %150, %149 : vector<1x32xf32>
      %cst_70 = arith.constant 0.333333343 : f32
      %152 = vector.broadcast %cst_70 : f32 to vector<1x32xf32>
      %153 = arith.mulf %151, %152 : vector<1x32xf32>
      %c3 = arith.constant 3 : index
      %154 = memref.load %arg1[%c3] : memref<6xi32, #tpu.memory_space<smem>>
      %c8_i32 = arith.constant 8 : i32
      %155 = arith.addi %c8_i32, %154 : i32
      %156 = arith.index_cast %155 : i32 to index
      %c0_71 = arith.constant 0 : index
      %157 = vector.load %arg20[%156, %c0_71] : memref<16x32xf32, #tpu.memory_space<vmem>>, vector<1x32xf32>
      %c4 = arith.constant 4 : index
      %158 = memref.load %arg1[%c4] : memref<6xi32, #tpu.memory_space<smem>>
      %c8_i32_72 = arith.constant 8 : i32
      %159 = arith.addi %c8_i32_72, %158 : i32
      %160 = arith.index_cast %159 : i32 to index
      %c0_73 = arith.constant 0 : index
      %161 = vector.load %arg20[%160, %c0_73] : memref<16x32xf32, #tpu.memory_space<vmem>>, vector<1x32xf32>
      %c5 = arith.constant 5 : index
      %162 = memref.load %arg1[%c5] : memref<6xi32, #tpu.memory_space<smem>>
      %c8_i32_74 = arith.constant 8 : i32
      %163 = arith.addi %c8_i32_74, %162 : i32
      %164 = arith.index_cast %163 : i32 to index
      %c0_75 = arith.constant 0 : index
      %165 = vector.load %arg20[%164, %c0_75] : memref<16x32xf32, #tpu.memory_space<vmem>>, vector<1x32xf32>
      %166 = arith.addf %157, %161 : vector<1x32xf32>
      %167 = arith.addf %166, %165 : vector<1x32xf32>
      %cst_76 = arith.constant 0.333333343 : f32
      %168 = vector.broadcast %cst_76 : f32 to vector<1x32xf32>
      %169 = arith.mulf %167, %168 : vector<1x32xf32>
      %170 = tpu.concatenate %153, %169 in 0 : vector<1x32xf32>, vector<1x32xf32> -> vector<2x32xf32>
      %171 = arith.truncf %170 : vector<2x32xf32> to vector<2x32xbf16>
      %c0_77 = arith.constant 0 : index
      %c0_78 = arith.constant 0 : index
      %172 = vector.load %arg15[%c0_77, %c0_78] : memref<32x16xbf16, #tpu.memory_space<vmem>>, vector<32x16xbf16>
      %cst_79 = arith.constant dense<0.000000e+00> : vector<2x16xf32>
      %173 = tpu.matmul %171, %172, %cst_79 {dimension_numbers = #tpu.dot_dimension_numbers<[1], [0], [0], [1], [0, 0, 1, 1], [], []>} : vector<2x32xbf16>, vector<32x16xbf16>, vector<2x16xf32> -> vector<2x16xf32>
      %c0_80 = arith.constant 0 : index
      %c0_81 = arith.constant 0 : index
      %174 = vector.load %arg16[%c0_80, %c0_81] : memref<1x16xf32, #tpu.memory_space<vmem>>, vector<1x16xf32>
      %175 = vector.broadcast %174 : vector<1x16xf32> to vector<2x16xf32>
      %176 = arith.addf %173, %175 : vector<2x16xf32>
      %cst_82 = arith.constant 0.000000e+00 : f32
      %177 = vector.broadcast %cst_82 : f32 to vector<2x16xf32>
      %178 = arith.maximumf %176, %177 : vector<2x16xf32>
      %179 = arith.truncf %178 : vector<2x16xf32> to vector<2x16xbf16>
      %c0_83 = arith.constant 0 : index
      %c0_84 = arith.constant 0 : index
      %180 = vector.load %arg17[%c0_83, %c0_84] : memref<16x128xbf16, #tpu.memory_space<vmem>>, vector<16x128xbf16>
      %cst_85 = arith.constant dense<0.000000e+00> : vector<2x128xf32>
      %181 = tpu.matmul %179, %180, %cst_85 {dimension_numbers = #tpu.dot_dimension_numbers<[1], [0], [0], [1], [0, 0, 1, 1], [], []>} : vector<2x16xbf16>, vector<16x128xbf16>, vector<2x128xf32> -> vector<2x128xf32>
      %c0_86 = arith.constant 0 : index
      %c0_87 = arith.constant 0 : index
      %182 = vector.load %arg18[%c0_86, %c0_87] : memref<1x128xf32, #tpu.memory_space<vmem>>, vector<1x128xf32>
      %183 = vector.broadcast %182 : vector<1x128xf32> to vector<2x128xf32>
      %184 = arith.addf %181, %183 : vector<2x128xf32>
      %185 = arith.negf %184 : vector<2x128xf32>
      %186 = math.exp %185 : vector<2x128xf32>
      %cst_88 = arith.constant 1.000000e+00 : f32
      %187 = vector.broadcast %cst_88 : f32 to vector<2x128xf32>
      %188 = arith.addf %187, %186 : vector<2x128xf32>
      %189 = arith.divf %187, %188 : vector<2x128xf32>
      %c0_89 = arith.constant 0 : index
      %c0_90 = arith.constant 0 : index
      %190 = vector.load %arg19[%c0_89, %c0_90] : memref<2x128xf32, #tpu.memory_space<vmem>>, vector<2x128xf32>
      tpu.vector_store %arg19[%c0_89, %c0_90], %189 {strides = array<i32>} : memref<2x128xf32, #tpu.memory_space<vmem>>, vector<2x128xf32>,
    } else {
    }
    return
  }
  func.func @transform_1(%arg0: i32, %arg1: memref<6xi32, #tpu.memory_space<smem>>) -> (i32, i32, i32) {
    %c0_i32 = arith.constant 0 : i32
    %c0_i32_0 = arith.constant 0 : i32
    %c0_i32_1 = arith.constant 0 : i32
    return %arg0, %c0_i32, %c0_i32_0 : i32, i32, i32
  }
  func.func @transform_2(%arg0: i32, %arg1: memref<6xi32, #tpu.memory_space<smem>>) -> (i32, i32, i32) {
    %c0_i32 = arith.constant 0 : i32
    %c0_i32_0 = arith.constant 0 : i32
    %c0_i32_1 = arith.constant 0 : i32
    return %arg0, %c0_i32, %c0_i32_0 : i32, i32, i32
  }
  func.func @transform_3(%arg0: i32, %arg1: memref<6xi32, #tpu.memory_space<smem>>) -> (i32, i32, i32) {
    %c0_i32 = arith.constant 0 : i32
    %c0_i32_0 = arith.constant 0 : i32
    %c0_i32_1 = arith.constant 0 : i32
    return %arg0, %c0_i32, %c0_i32_0 : i32, i32, i32
  }
  func.func @transform_4(%arg0: i32, %arg1: memref<6xi32, #tpu.memory_space<smem>>) -> (i32, i32, i32) {
    %c0_i32 = arith.constant 0 : i32
    %c0_i32_0 = arith.constant 0 : i32
    %c0_i32_1 = arith.constant 0 : i32
    return %arg0, %c0_i32, %c0_i32_0 : i32, i32, i32
  }
  func.func @transform_5(%arg0: i32, %arg1: memref<6xi32, #tpu.memory_space<smem>>) -> (i32, i32, i32) {
    %c0_i32 = arith.constant 0 : i32
    %c0_i32_0 = arith.constant 0 : i32
    %c0_i32_1 = arith.constant 0 : i32
    return %arg0, %c0_i32, %c0_i32_0 : i32, i32, i32
  }
  func.func @transform_6(%arg0: i32, %arg1: memref<6xi32, #tpu.memory_space<smem>>) -> (i32, i32, i32) {
    %c0_i32 = arith.constant 0 : i32
    %c0_i32_0 = arith.constant 0 : i32
    %c0_i32_1 = arith.constant 0 : i32
    return %arg0, %c0_i32, %c0_i32_0 : i32, i32, i32
  }
  func.func @transform_7(%arg0: i32, %arg1: memref<6xi32, #tpu.memory_space<smem>>) -> (i32, i32, i32) {
    %c0_i32 = arith.constant 0 : i32
    %c0_i32_0 = arith.constant 0 : i32
    %c0_i32_1 = arith.constant 0 : i32
    return %arg0, %c0_i32, %c0_i32_0 : i32, i32, i32
  }
  func.func @transform_8(%arg0: i32, %arg1: memref<6xi32, #tpu.memory_space<smem>>) -> (i32, i32, i32) {
    %c0_i32 = arith.constant 0 : i32
    %c0_i32_0 = arith.constant 0 : i32
    %c0_i32_1 = arith.constant 0 : i32
    return %arg0, %c0_i32, %c0_i32_0 : i32, i32, i32
  }
  func.func @transform_9(%arg0: i32, %arg1: memref<6xi32, #tpu.memory_space<smem>>) -> (i32, i32, i32) {
    %c0_i32 = arith.constant 0 : i32
    %c0_i32_0 = arith.constant 0 : i32
    %c0_i32_1 = arith.constant 0 : i32
    return %arg0, %c0_i32, %c0_i32_0 : i32, i32, i32
  }
  func.func @transform_10(%arg0: i32, %arg1: memref<6xi32, #tpu.memory_space<smem>>) -> (i32, i32, i32) {
    %c0_i32 = arith.constant 0 : i32
    %c0_i32_0 = arith.constant 0 : i32
    %c0_i32_1 = arith.constant 0 : i32
    return %arg0, %c0_i32, %c0_i32_0 : i32, i32, i32
  }
  func.func @transform_11(%arg0: i32, %arg1: memref<6xi32, #tpu.memory_space<smem>>) -> (i32, i32, i32) {
    %c0_i32 = arith.constant 0 : i32
    %c0_i32_0 = arith.constant 0 : i32
    %c0_i32_1 = arith.constant 0 : i32
    return %arg0, %c0_i32, %c0_i32_0 : i32, i32, i32
  }
  func.func @transform_12(%arg0: i32, %arg1: memref<6xi32, #tpu.memory_space<smem>>) -> (i32, i32, i32) {
    %c0_i32 = arith.constant 0 : i32
    %c0_i32_0 = arith.constant 0 : i32
    %c0_i32_1 = arith.constant 0 : i32
    return %arg0, %c0_i32, %c0_i32_0 : i32, i32, i32
  }
  func.func @transform_13(%arg0: i32, %arg1: memref<6xi32, #tpu.memory_space<smem>>) -> (i32, i32) {
    %c0_i32 = arith.constant 0 : i32
    %c0_i32_0 = arith.constant 0 : i32
    %c0_i32_1 = arith.constant 0 : i32
    return %c0_i32, %c0_i32_0 : i32, i32
  }
  func.func @transform_14(%arg0: i32, %arg1: memref<6xi32, #tpu.memory_space<smem>>) -> (i32, i32) {
    %c0_i32 = arith.constant 0 : i32
    %c0_i32_0 = arith.constant 0 : i32
    %c0_i32_1 = arith.constant 0 : i32
    return %c0_i32, %c0_i32_0 : i32, i32
  }
  func.func @transform_15(%arg0: i32, %arg1: memref<6xi32, #tpu.memory_space<smem>>) -> (i32, i32) {
    %c0_i32 = arith.constant 0 : i32
    %c0_i32_0 = arith.constant 0 : i32
    %c0_i32_1 = arith.constant 0 : i32
    return %c0_i32, %c0_i32_0 : i32, i32
  }
  func.func @transform_16(%arg0: i32, %arg1: memref<6xi32, #tpu.memory_space<smem>>) -> (i32, i32) {
    %c0_i32 = arith.constant 0 : i32
    %c0_i32_0 = arith.constant 0 : i32
    %c0_i32_1 = arith.constant 0 : i32
    return %c0_i32, %c0_i32_0 : i32, i32
  }
  func.func @transform_17(%arg0: i32, %arg1: memref<6xi32, #tpu.memory_space<smem>>) -> (i32, i32) {
    %c0_i32 = arith.constant 0 : i32
    %c0_i32_0 = arith.constant 0 : i32
    %c0_i32_1 = arith.constant 0 : i32
    return %c0_i32, %c0_i32_0 : i32, i32
  }
}

</mosaic_0001>

<bundles_post_ra>
// kernel: action_classifier_forward.1
= control target key start
LH: loop header
LB: loop body
LE: loop exit
PB: predicated region body
PF: predicated region fallthrough
CT: control target
= control target key end

     0   :  { %s4358_s0 = inlined_call_operand.hbm [shape: s32[6], index: 0, kind: input, shape index: {}]   ;;  %s4359_s1 = inlined_call_operand.hbm [shape: f32[16,32], index: 1, kind: input, shape index: {}]   ;;  %s4360_s2 = inlined_call_operand.hbm [shape: bf16[2,32,96], index: 2, kind: input, shape index: {}]   ;;  %s4361_s3 = inlined_call_operand.hbm [shape: f32[2,1,96], index: 3, kind: input, shape index: {}]   ;;  %s4362_s4 = inlined_call_operand.hbm [shape: bf16[2,32,32], index: 4, kind: input, shape index: {}]   ;;  %s4363_s5 = inlined_call_operand.hbm [shape: f32[2,1,32], index: 5, kind: input, shape index: {}]   ;;  %s4364_s6 = inlined_call_operand.hbm [shape: f32[2,1,32], index: 6, kind: input, shape index: {}]   ;;  %s4365_s7 = inlined_call_operand.hbm [shape: f32[2,1,32], index: 7, kind: input, shape index: {}]   ;;  %s4366_s8 = inlined_call_operand.hbm [shape: bf16[2,32,64], index: 8, kind: input, shape index: {}]   ;;  %s4367_s9 = inlined_call_operand.hbm [shape: f32[2,1,64], index: 9, kind: input, shape index: {}]   ;;  %s4368_s10 = inlined_call_operand.hbm [shape: bf16[2,64,32], index: 10, kind: input, shape index: {}]   ;;  %s4369_s11 = inlined_call_operand.hbm [shape: f32[2,1,32], index: 11, kind: input, shape index: {}]   ;;  %s4370_s12 = inlined_call_operand.hbm [shape: f32[2,1,32], index: 12, kind: input, shape index: {}]   ;;  %s4371_s13 = inlined_call_operand.hbm [shape: f32[2,1,32], index: 13, kind: input, shape index: {}]   ;;  %s4372_s14 = inlined_call_operand.hbm [shape: bf16[32,16], index: 14, kind: input, shape index: {}]   ;;  %s4373_s15 = inlined_call_operand.hbm [shape: f32[1,16], index: 15, kind: input, shape index: {}]   ;;  %s4374_s16 = inlined_call_operand.hbm [shape: bf16[16,128], index: 16, kind: input, shape index: {}]   ;;  %s4375_s17 = inlined_call_operand.hbm [shape: f32[1,128], index: 17, kind: input, shape index: {}]   ;;  %s4376_s18 = inlined_call_operand.hbm [shape: f32[2,128], index: 18, kind: output, shape index: {}]  }
   0x1   :  { %4418 = sst [smem:[#allocation57_spill]] %s4358_s0 }
   0x2   :  { %4419 = sst [smem:[#allocation58_spill]] %s4359_s1  ;;  %s4428_s29 = sld [smem:[#allocation57_spill]] }
   0x3   :  { %4420 = sst [smem:[#allocation59_spill]] %s4360_s2 }
   0x4   :  { %4421 = sst [smem:[#allocation60_spill]] %s4361_s3 }
   0x5   :  { %4422 = sst [smem:[#allocation61_spill]] %s4362_s4 }
   0x6   :  { %4423 = sst [smem:[#allocation62_spill]] %s4366_s8 }
   0x7   :  { %4424 = sst [smem:[#allocation63_spill]] %s4368_s10 }
   0x8   :  { %4425 = sst [smem:[#allocation64_spill]] %s4370_s12  ;;  %s2787_s12 = scalar_lea.hbm %s4428_s29, 16 }
   0x9   :  { %4426 = sst [smem:[#allocation65_spill]] %s4371_s13  ;;  %p2788_p0 = scmp.ne.s32.totalorder %s4428_s29, %s2787_s12 }
   0xa   :  { %4427 = sst [smem:[#allocation66_spill]] %s4376_s18  ;;  %p2791_p1 = scmp.lt.u32.totalorder %s2787_s12, %s4428_s29 }
   0xc   :  { %p2793_p2 = pnand %p2791_p1, %p2788_p0 }
   0xe   :  { %2796 = shalt.err (!%p2793_p2)  }
   0xf   :  { %s3403_s20 = smov [#allocation5]  }
  0x10   :  { %24 = dma.hbm_to_smem %s4428_s29, 16, %s3403_s20, [#allocation4] }
  0x11   :  { %3337 = dma.done.wait [#allocation4], 16 }
  0x12   :  { %3338 = vsyncadd [#allocation4], 4294967280 }
  0x13   :  { %26 = sfence }
  0x14   :  { %27 = vsyncpa [#allocation7], 0 }
  0x15   :  { %29 = vsyncpa [#allocation7 + $0x1], 0 }
  0x16   :  { %30 = vsyncpa [#allocation10], 0 }
  0x17   :  { %32 = vsyncpa [#allocation10 + $0x1], 0 }
  0x18   :  { %33 = vsyncpa [#allocation13], 0 }
  0x19   :  { %35 = vsyncpa [#allocation13 + $0x1], 0 }
  0x1a   :  { %36 = vsyncpa [#allocation16], 0 }
  0x1b   :  { %38 = vsyncpa [#allocation16 + $0x1], 0 }
  0x1c   :  { %39 = vsyncpa [#allocation19], 0 }
  0x1d   :  { %41 = vsyncpa [#allocation19 + $0x1], 0 }
  0x1e   :  { %42 = vsyncpa [#allocation22], 0 }
  0x1f   :  { %44 = vsyncpa [#allocation22 + $0x1], 0 }
  0x20   :  { %45 = vsyncpa [#allocation25], 0 }
  0x21   :  { %47 = vsyncpa [#allocation25 + $0x1], 0 }
  0x22   :  { %48 = vsyncpa [#allocation28], 0 }
  0x23   :  { %49 = vsyncpa [#allocation31], 0 }
  0x24   :  { %50 = vsyncpa [#allocation8], 0  ;;  %s3539_s12 = smov 0   ;;  %s3541_s2 = smov 0  }
  0x25   :  { %s3543_s23 = smov 0   ;;  %s3545_s24 = smov 0  }
  0x26 LB: > { %4429 = sst [smem:[#allocation50_spill]] %s3393_s2  ;;  %s3558_s25 = sadd.s32 4294967295, %s3401_s24   ;;  %s3401_s24 = sphi %s3545_s24, %s4500_s24   ;;  %s3397_s23 = sphi %s3543_s23, %s4503_s23   ;;  %s3393_s2 = sphi %s3541_s2, %s4502_s2   ;;  %s3389_s12 = sphi %s3539_s12, %s4501_s12  }
  0x27   : > { %4430 = sst [smem:[#allocation51_spill]] %s3397_s23  ;;  %s3561_s26 = sadd.s32 1, %s3401_s24  }
  0x28   : > { %4431 = sst [smem:[#allocation52_spill]] %s3558_s25  ;;  %s60_s27 = ssub.s32 %s3401_s24, %s3561_s26 }
  0x29   : > { %4432 = sst [smem:[#allocation53_spill]] %s3561_s26  ;;  %s63_s28 = sadd.s32 1, %s3397_s23 }
  0x2a   : > { %p61_p3 = scmp.eq.s32.totalorder %s60_s27, 0  ;;  %p70_p4 = scmp.ne.s32.totalorder %s3397_s23, %s3393_s2 }
  0x2b   : > { %p71_p5 = scmp.eq.s32.totalorder %s3401_s24, 0  ;;  %p76_p6 = scmp.ne.s32.totalorder %s3393_s2, %s3389_s12 }
  0x2c   : > { %s3571_s29 = scalar_select %p61_p3, %s3397_s23, %s63_s28  }
  0x2d   : > { %p3573_p7 = por %p71_p5, %p70_p4  ;;  %p4385_p8 = scmp.eq.s32.totalorder %s3558_s25, 0 }
  0x2e   : > { %4433 = sst [smem:[#allocation54_spill]] %s3571_s29  ;;  %p2349_p9 = scmp.ge.s32.totalorder %s3401_s24, 1 }
  0x2f   : > { %p478_p10 = scmp.lt.s32.totalorder %s3401_s24, 3  ;;  %p3582_p11 = por %p4385_p8, %p76_p6 }
  0x30   : > { %s3404_s1 = smov [#allocation26]   ;;  %p2675_p1 = scmp.lt.s32.totalorder %s3401_s24, 2 }
  0x31   : > { %s4435_s0 = scalar_select %p3582_p11, 1, 0 }
  0x32   : > { %p3586_p12 = pnand %p2349_p9, %p478_p10  ;;  %s490_s20 = sshll.u32 %s3404_s1, 4  ;;  %s491_s20 = int_to_ptr.vmem [resolvable:$true] %s490_s20 }
  0x33   : > { %4436 = sst [smem:[#allocation55_spill]] %s4435_s0  ;;  %s3600_s22 = sand.u32 1, %s3397_s23  }
  0x34   : > { %s4437_s19 = scalar_select %p3586_p12, 1, 0 }
  0x35   : > { %p2621_p13 = pneg %p3586_p12  ;;  %p3604_p2 = pnand %p2675_p1, %p3573_p7 }
  0x36   : > { %4438 = sst [smem:[#allocation56_spill]] %s4437_s19  ;;  %s2797_s1 = scalar_lea.hbm %s4372_s14, 256 }
  0x37   : > { %p3594_p0 = pnand %p2621_p13, %p4385_p8  ;;  %p2798_p3 = scmp.ne.s32.totalorder %s4372_s14, %s2797_s1 }
  0x38   : > { %s4440_s12 = scalar_select %p3604_p2, 1, 0 }
  0x39   : > { %s4439_s21 = scalar_select %p3594_p0, 1, 0 }
  0x3a   : > { %p3616_p4 = pneg %p3594_p0  ;;  %p2804_p7 = scmp.lt.u32.totalorder %s2797_s1, %s4372_s14 }
  0x3c   : > { %s4441_s18 = scalar_select %p3616_p4, 1, 0 }
  0x3d   : > { %p2800_p5 = pnand %p3616_p4, %p2798_p3 }
  0x3f   : > { %p2801_p6 = pneg %p2800_p5 }
  0x41   : > { %p2806_p9 = pnand %p2804_p7, %p2801_p6 }
  0x43   : > { %2809 = shalt.err (!%p2806_p9)
}
  0x44   : > { %s2810_s27 = scalar_lea.vmem %s491_s20, 256  ;;  %p2818_p8 = scmp.lt.s32.totalorder %s491_s20, %s491_s20 }
  0x45   : > { %p2811_p10 = scmp.ne.s32.totalorder %s491_s20, %s2810_s27  ;;  %p2819_p11 = scmp.lt.s32.totalorder %s2810_s27, %s2810_s27 }
  0x47   : > { %p2813_p13 = pnand %p2811_p10, %p3616_p4  ;;  %p2820_p12 = por %p2819_p11, %p2818_p8 }
  0x49   : > { %p2814_p1 = pneg %p2813_p13 }
  0x4b   : > { %p2821_p2 = pnand %p2820_p12, %p2814_p1 }
  0x4d   : > { %2824 = shalt.err (!%p2821_p2)
}
  0x4e   : > { %s4403_s26 = smov 64   ;;  %s4406_s29 = smov 4  }
  0x4f   : > { %2624 = dma.hbm_to_vmem [thread:$0]  (!%p3594_p0), %s4372_s14, 256, %s491_s20, [#allocation25], %s4403_s26, %s4403_s26, %s4406_s29  }
  0x50   : > { %s3407_s1 = smov [#allocation27]   ;;  %s3636_s27 = sand.u32 1, %s3401_s24  }
  0x51   : > { %s504_s30 = sshll.u32 %s3407_s1, 4  ;;  %s2825_s2 = scalar_lea.hbm %s4373_s15, 16  ;;  %s505_s30 = int_to_ptr.vmem [resolvable:$true] %s504_s30 }
  0x52   : > { %p2826_p8 = scmp.ne.s32.totalorder %s4373_s15, %s2825_s2  ;;  %p2832_p2 = scmp.lt.u32.totalorder %s2825_s2, %s4373_s15 }
  0x54   : > { %p2828_p11 = pnand %p2826_p8, %p3616_p4 }
  0x56   : > { %p2829_p12 = pneg %p2828_p11 }
  0x58   : > { %p2834_p3 = pnand %p2832_p2, %p2829_p12 }
  0x5a   : > { %2837 = shalt.err (!%p2834_p3)
}
  0x5b   : > { %s2838_s20 = scalar_lea.vmem %s505_s30, 16  ;;  %s2845_s25 = scalar_lea.vmem %s505_s30, 32 }
  0x5c   : > { %p2839_p5 = scmp.ne.s32.totalorder %s505_s30, %s2838_s20  ;;  %p2846_p9 = scmp.lt.s32.totalorder %s505_s30, %s505_s30 }
  0x5d   : > { %p2847_p10 = scmp.lt.s32.totalorder %s2845_s25, %s2838_s20 }
  0x5e   : > { %p2841_p6 = pnand %p2839_p5, %p3616_p4 }
  0x5f   : > { %p2848_p13 = por %p2847_p10, %p2846_p9 }
  0x60   : > { %p2842_p7 = pneg %p2841_p6 }
  0x62   : > { %p2849_p1 = pnand %p2848_p13, %p2842_p7 }
  0x64   : > { %2852 = shalt.err (!%p2849_p1)
}
  0x65   : > { %2627 = dma.hbm_to_vmem [thread:$0]  (!%p3594_p0), %s4373_s15, 16, %s505_s30, [#allocation28]  }
  0x66   : > { %s3657_s8 = sshll.u32 %s3401_s24, 4  ;;  %s563_s10 = scalar_lea.vmem [#allocation9], %s3600_s22 }
  0x67   : > { %s570_s2 = sshll.u32 %s563_s10, 4  ;;  %s4442_s3 = sld [smem:[#allocation60_spill]]  ;;  %s3666_s2 = int_to_ptr.vmem [resolvable:$true] %s570_s2 }
  0x68   : > { %s4405_s1 = scalar_lea.sflag [#allocation10], %s3636_s27  ;;  %p4443_p11 = scmp.ne.s32.totalorder %s4440_s12, 0 }
  0x6a   : > { %p3673_p12 = pneg %p4443_p11 }
  0x6c   : > { %s4444_s30 = scalar_select %p3673_p12, 1, 0 }
  0x6d   : > { %s3664_s28 = scalar_lea.hbm %s4442_s3, %s3657_s8  ;;  %s2858_s0 = scalar_lea.hbm %s4442_s3, 32 }
  0x6e   : > { %s2853_s20 = scalar_lea.hbm %s3664_s28, 16  ;;  %p2859_p5 = scmp.lt.u32.totalorder %s3664_s28, %s4442_s3 }
  0x6f   : > { %p2854_p8 = scmp.ne.s32.totalorder %s3664_s28, %s2853_s20  ;;  %p2860_p6 = scmp.lt.u32.totalorder %s2858_s0, %s2853_s20 }
  0x70   : > { %p2862_p9 = scmp.lt.u32.totalorder %s2853_s20, %s3664_s28 }
  0x71   : > { %p2856_p2 = pnand %p3673_p12, %p2854_p8  ;;  %p2861_p7 = por %p2860_p6, %p2859_p5 }
  0x73   : > { %p2857_p3 = pneg %p2856_p2  ;;  %p2863_p10 = por %p2862_p9, %p2861_p7 }
  0x75   : > { %p2864_p13 = pnand %p2863_p10, %p2857_p3 }
  0x77   : > { %2867 = shalt.err (!%p2864_p13)
}
  0x78   : > { %s2868_s23 = scalar_lea.vmem %s3666_s2, 16  ;;  %s3408_s25 = smov [#allocation9]  }
  0x79   : > { %p2869_p1 = scmp.ne.s32.totalorder %s3666_s2, %s2868_s23  ;;  %s2873_s13 = sshll.u32 %s3408_s25, 4  ;;  %s2874_s13 = int_to_ptr.vmem [resolvable:$false] %s2873_s13 }
  0x7a   : > { %s2875_s10 = scalar_lea.vmem %s2874_s13, 32  ;;  %p2876_p0 = scmp.lt.s32.totalorder %s3666_s2, %s2874_s13 }
  0x7b   : > { %p2871_p8 = pnand %p2869_p1, %p3673_p12  ;;  %p2877_p4 = scmp.lt.s32.totalorder %s2875_s10, %s2868_s23 }
  0x7d   : > { %p2872_p2 = pneg %p2871_p8  ;;  %p2878_p5 = por %p2877_p4, %p2876_p0 }
  0x7f   : > { %p2879_p6 = pnand %p2878_p5, %p2872_p2 }
  0x81   : > { %2882 = shalt.err (!%p2879_p6)
}
  0x82   : > { %2640 = dma.hbm_to_vmem [thread:$0]  (!%p4443_p11), %s3664_s28, 16, %s3666_s2, %s4405_s1  }
  0x83   : > { %s3702_s19 = scalar_lea.hbm %s4363_s5, %s3657_s8  ;;  %s601_s23 = scalar_lea.vmem [#allocation12], %s3600_s22 }
  0x84   : > { %s608_s25 = sshll.u32 %s601_s23, 4  ;;  %s4409_s13 = scalar_lea.sflag [#allocation13], %s3636_s27  ;;  %s609_s25 = int_to_ptr.vmem [resolvable:$true] %s608_s25 }
  0x85   : > { %s2883_s10 = scalar_lea.hbm %s3702_s19, 16  ;;  %s2888_s28 = scalar_lea.hbm %s4363_s5, 32 }
  0x86   : > { %p2884_p0 = scmp.ne.s32.totalorder %s3702_s19, %s2883_s10  ;;  %p2889_p7 = scmp.lt.u32.totalorder %s3702_s19, %s4363_s5 }
  0x87   : > { %p2890_p9 = scmp.lt.u32.totalorder %s2888_s28, %s2883_s10  ;;  %p2892_p13 = scmp.lt.u32.totalorder %s2883_s10, %s3702_s19 }
  0x88   : > { %p2886_p4 = pnand %p2884_p0, %p3673_p12 }
  0x89   : > { %p2891_p10 = por %p2890_p9, %p2889_p7 }
  0x8a   : > { %p2887_p3 = pneg %p2886_p4 }
  0x8b   : > { %p2893_p1 = por %p2892_p13, %p2891_p10 }
  0x8d   : > { %p2894_p8 = pnand %p2893_p1, %p2887_p3 }
  0x8f   : > { %2897 = shalt.err (!%p2894_p8)
}
  0x90   : > { %s2898_s23 = scalar_lea.vmem %s609_s25, 16  ;;  %s3409_s1 = smov [#allocation12]  }
  0x91   : > { %p2899_p2 = scmp.ne.s32.totalorder %s609_s25, %s2898_s23  ;;  %s2903_s29 = sshll.u32 %s3409_s1, 4  ;;  %s2904_s29 = int_to_ptr.vmem [resolvable:$false] %s2903_s29 }
  0x92   : > { %s2905_s26 = scalar_lea.vmem %s2904_s29, 32  ;;  %p2906_p0 = scmp.lt.s32.totalorder %s609_s25, %s2904_s29 }
  0x93   : > { %p2901_p5 = pnand %p2899_p2, %p3673_p12  ;;  %p2907_p4 = scmp.lt.s32.totalorder %s2905_s26, %s2898_s23 }
  0x95   : > { %p2902_p6 = pneg %p2901_p5  ;;  %p2908_p11 = por %p2907_p4, %p2906_p0 }
  0x97   : > { %p2909_p7 = pnand %p2908_p11, %p2902_p6 }
  0x99   : > { %2912 = shalt.err (!%p2909_p7)
}
  0x9a   : > { %p4445_p9 = scmp.ne.s32.totalorder %s4440_s12, 0  ;;  %s3729_s1 = scalar_lea.hbm %s4365_s7, %s3657_s8 }
  0x9b   : > { %s635_s29 = scalar_lea.vmem [#allocation15], %s3600_s22  ;;  %s4410_s20 = scalar_lea.sflag [#allocation16], %s3636_s27 }
  0x9c   : > { %2646 = dma.hbm_to_vmem [thread:$0]  (!%p4445_p9), %s3702_s19, 16, %s609_s25, %s4409_s13  }
  0x9d   : > { %s642_s28 = sshll.u32 %s635_s29, 4  ;;  %s2913_s0 = scalar_lea.hbm %s3729_s1, 16  ;;  %s643_s28 = int_to_ptr.vmem [resolvable:$true] %s642_s28 }
  0x9e   : > { %p2914_p11 = scmp.ne.s32.totalorder %s3729_s1, %s2913_s0  ;;  %s2918_s25 = scalar_lea.hbm %s4365_s7, 32 }
  0x9f   : > { %p2919_p13 = scmp.lt.u32.totalorder %s3729_s1, %s4365_s7  ;;  %p2920_p1 = scmp.lt.u32.totalorder %s2918_s25, %s2913_s0 }
  0xa0   : > { %p2916_p3 = pnand %p2914_p11, %p3673_p12  ;;  %p2922_p2 = scmp.lt.u32.totalorder %s2913_s0, %s3729_s1 }
  0xa1   : > { %p2921_p8 = por %p2920_p1, %p2919_p13 }
  0xa2   : > { %p2917_p10 = pneg %p2916_p3 }
  0xa3   : > { %p2923_p5 = por %p2922_p2, %p2921_p8 }
  0xa5   : > { %p2924_p6 = pnand %p2923_p5, %p2917_p10 }
  0xa7   : > { %2927 = shalt.err (!%p2924_p6)
}
  0xa8   : > { %s2928_s2 = scalar_lea.vmem %s643_s28, 16  ;;  %s3410_s29 = smov [#allocation15]  }
  0xa9   : > { %p2929_p0 = scmp.ne.s32.totalorder %s643_s28, %s2928_s2  ;;  %s2933_s13 = sshll.u32 %s3410_s29, 4  ;;  %s2934_s13 = int_to_ptr.vmem [resolvable:$false] %s2933_s13 }
  0xaa   : > { %s2935_s23 = scalar_lea.vmem %s2934_s13, 32  ;;  %p2936_p11 = scmp.lt.s32.totalorder %s643_s28, %s2934_s13 }
  0xab   : > { %p2931_p4 = pnand %p2929_p0, %p3673_p12  ;;  %p2937_p3 = scmp.lt.s32.totalorder %s2935_s23, %s2928_s2 }
  0xad   : > { %p2932_p7 = pneg %p2931_p4  ;;  %p2938_p9 = por %p2937_p3, %p2936_p11 }
  0xaf   : > { %p2939_p1 = pnand %p2938_p9, %p2932_p7 }
  0xb1   : > { %2942 = shalt.err (!%p2939_p1)
}
  0xb2   : > { %p4446_p13 = scmp.ne.s32.totalorder %s4440_s12, 0  ;;  %s3756_s25 = scalar_lea.hbm %s4367_s9, %s3657_s8 }
  0xb3   : > { %s673_s13 = scalar_lea.vmem [#allocation18], %s3600_s22  ;;  %s4411_s10 = scalar_lea.sflag [#allocation19], %s3636_s27 }
  0xb4   : > { %2652 = dma.hbm_to_vmem [thread:$0]  (!%p4446_p13), %s3729_s1, 16, %s643_s28, %s4410_s20  }
  0xb5   : > { %s680_s26 = sshll.u32 %s673_s13, 4  ;;  %s2943_s2 = scalar_lea.hbm %s3756_s25, 16  ;;  %s681_s26 = int_to_ptr.vmem [resolvable:$true] %s680_s26 }
  0xb6   : > { %p2944_p9 = scmp.ne.s32.totalorder %s3756_s25, %s2943_s2  ;;  %s2948_s28 = scalar_lea.hbm %s4367_s9, 32 }
  0xb7   : > { %p2949_p2 = scmp.lt.u32.totalorder %s3756_s25, %s4367_s9  ;;  %p2950_p5 = scmp.lt.u32.totalorder %s2948_s28, %s2943_s2 }
  0xb8   : > { %p2946_p10 = pnand %p2944_p9, %p3673_p12  ;;  %p2952_p0 = scmp.lt.u32.totalorder %s2943_s2, %s3756_s25 }
  0xb9   : > { %p2951_p6 = por %p2950_p5, %p2949_p2 }
  0xba   : > { %p2947_p8 = pneg %p2946_p10 }
  0xbb   : > { %p2953_p4 = por %p2952_p0, %p2951_p6 }
  0xbd   : > { %p2954_p7 = pnand %p2953_p4, %p2947_p8 }
  0xbf   : > { %2957 = shalt.err (!%p2954_p7)
}
  0xc0   : > { %s2958_s19 = scalar_lea.vmem %s681_s26, 16  ;;  %s3411_s13 = smov [#allocation18]  }
  0xc1   : > { %p2959_p11 = scmp.ne.s32.totalorder %s681_s26, %s2958_s19  ;;  %s2963_s20 = sshll.u32 %s3411_s13, 4  ;;  %s2964_s20 = int_to_ptr.vmem [resolvable:$false] %s2963_s20 }
  0xc2   : > { %s2965_s29 = scalar_lea.vmem %s2964_s20, 32  ;;  %p2966_p9 = scmp.lt.s32.totalorder %s681_s26, %s2964_s20 }
  0xc3   : > { %p2961_p3 = pnand %p2959_p11, %p3673_p12  ;;  %p2967_p10 = scmp.lt.s32.totalorder %s2965_s29, %s2958_s19 }
  0xc5   : > { %p2962_p1 = pneg %p2961_p3  ;;  %p2968_p13 = por %p2967_p10, %p2966_p9 }
  0xc7   : > { %p2969_p2 = pnand %p2968_p13, %p2962_p1 }
  0xc9   : > { %2972 = shalt.err (!%p2969_p2)
}
  0xca   : > { %p4447_p5 = scmp.ne.s32.totalorder %s4440_s12, 0  ;;  %s3783_s28 = scalar_lea.hbm %s4369_s11, %s3657_s8 }
  0xcb   : > { %s711_s20 = scalar_lea.vmem [#allocation21], %s3600_s22  ;;  %s3412_s0 = smov [#allocation29]  }
  0xcc   : > { %2658 = dma.hbm_to_vmem [thread:$0]  (!%p4447_p5), %s3756_s25, 16, %s681_s26, %s4411_s10  }
  0xcd   : > { %s718_s23 = sshll.u32 %s711_s20, 4  ;;  %s3788_s19 = sshll.u32 %s3412_s0, 4  ;;  %s3786_s23 = int_to_ptr.vmem [resolvable:$true] %s718_s23  ;;  %s515_s19 = int_to_ptr.vmem [resolvable:$true] %s3788_s19 }
  0xce   : > { %s4413_s13 = scalar_lea.sflag [#allocation22], %s3636_s27  ;;  %s2973_s29 = scalar_lea.hbm %s3783_s28, 16 }
  0xcf   : > { %p2974_p13 = scmp.ne.s32.totalorder %s3783_s28, %s2973_s29  ;;  %s2978_s2 = scalar_lea.hbm %s4369_s11, 32 }
  0xd0   : > { %p2979_p0 = scmp.lt.u32.totalorder %s3783_s28, %s4369_s11  ;;  %p2980_p4 = scmp.lt.u32.totalorder %s2978_s2, %s2973_s29 }
  0xd1   : > { %p2976_p8 = pnand %p2974_p13, %p3673_p12  ;;  %p2982_p11 = scmp.lt.u32.totalorder %s2973_s29, %s3783_s28 }
  0xd2   : > { %p2981_p7 = por %p2980_p4, %p2979_p0 }
  0xd3   : > { %p2977_p6 = pneg %p2976_p8 }
  0xd4   : > { %p2983_p3 = por %p2982_p11, %p2981_p7 }
  0xd6   : > { %p2984_p1 = pnand %p2983_p3, %p2977_p6 }
  0xd8   : > { %2987 = shalt.err (!%p2984_p1)
}
  0xd9   : > { %s2988_s20 = scalar_lea.vmem %s3786_s23, 16  ;;  %s3413_s0 = smov [#allocation21]  }
  0xda   : > { %p2989_p9 = scmp.ne.s32.totalorder %s3786_s23, %s2988_s20  ;;  %s2993_s25 = sshll.u32 %s3413_s0, 4  ;;  %s2994_s25 = int_to_ptr.vmem [resolvable:$false] %s2993_s25 }
  0xdb   : > { %s2995_s10 = scalar_lea.vmem %s2994_s25, 32  ;;  %p2996_p13 = scmp.lt.s32.totalorder %s3786_s23, %s2994_s25 }
  0xdc   : > { %p2991_p10 = pnand %p2989_p9, %p3673_p12  ;;  %p2997_p8 = scmp.lt.s32.totalorder %s2995_s10, %s2988_s20 }
  0xde   : > { %p2992_p2 = pneg %p2991_p10  ;;  %p2998_p0 = por %p2997_p8, %p2996_p13 }
  0xe0   : > { %p2999_p4 = pnand %p2998_p0, %p2992_p2 }
  0xe2   : > { %3002 = shalt.err (!%p2999_p4)
}
  0xe3   : > { %2664 = dma.hbm_to_vmem [thread:$0]  (!%p4447_p5), %s3783_s28, 16, %s3786_s23, %s4413_s13  }
  0xe4   : > { %s3003_s2 = scalar_lea.hbm %s4374_s16, 128  ;;  %p4448_p7 = scmp.ne.s32.totalorder %s4441_s18, 0 }
  0xe5   : > { %p3004_p6 = scmp.ne.s32.totalorder %s4374_s16, %s3003_s2  ;;  %p3010_p1 = scmp.lt.u32.totalorder %s3003_s2, %s4374_s16 }
  0xe7   : > { %p3006_p11 = pnand %p3004_p6, %p4448_p7 }
  0xe9   : > { %p3007_p3 = pneg %p3006_p11 }
  0xeb   : > { %p3012_p9 = pnand %p3010_p1, %p3007_p3 }
  0xed   : > { %3015 = shalt.err (!%p3012_p9)
}
  0xee   : > { %s3016_s10 = scalar_lea.vmem %s515_s19, 128  ;;  %p3024_p8 = scmp.lt.s32.totalorder %s515_s19, %s515_s19 }
  0xef   : > { %p3017_p10 = scmp.ne.s32.totalorder %s515_s19, %s3016_s10  ;;  %p3025_p0 = scmp.lt.s32.totalorder %s3016_s10, %s3016_s10 }
  0xf1   : > { %p3019_p2 = pnand %p3017_p10, %p4448_p7  ;;  %p3026_p4 = por %p3025_p0, %p3024_p8 }
  0xf3   : > { %p3020_p13 = pneg %p3019_p2 }
  0xf5   : > { %p3027_p5 = pnand %p3026_p4, %p3020_p13 }
  0xf7   : > { %3030 = shalt.err (!%p3027_p5)
}
  0xf8   : > { %p4449_p6 = scmp.ne.s32.totalorder %s4439_s21, 0  ;;  %s4450_s28 = smov 4  }
  0xf9   : > { %s4451_s23 = smov 64   ;;  %s3414_s2 = smov [#allocation30]  }
  0xfa   : > { %2630 = dma.hbm_to_vmem [thread:$0]  (!%p4449_p6), %s4374_s16, 128, %s515_s19, [#allocation28], %s4451_s23, %s4451_s23, %s4450_s28  }
  0xfb   : > { %s528_s1 = sshll.u32 %s3414_s2, 4  ;;  %s3837_s0 = sshll.u32 %s3600_s22, 4  ;;  %s529_s1 = int_to_ptr.vmem [resolvable:$true] %s528_s1 }
  0xfc   : > { %s3031_s10 = scalar_lea.hbm %s4375_s17, 16 }
  0xfd   : > { %p3032_p5 = scmp.ne.s32.totalorder %s4375_s17, %s3031_s10  ;;  %p3038_p1 = scmp.lt.u32.totalorder %s3031_s10, %s4375_s17 }
  0xff   : > { %p3034_p11 = pnand %p3032_p5, %p4448_p7 }
 0x101   : > { %p3035_p3 = pneg %p3034_p11 }
 0x103   : > { %p3040_p9 = pnand %p3038_p1, %p3035_p3 }
 0x105   : > { %3043 = shalt.err (!%p3040_p9)
}
 0x106   : > { %s3044_s19 = scalar_lea.vmem %s529_s1, 16  ;;  %s3051_s2 = scalar_lea.vmem %s529_s1, 32 }
 0x107   : > { %p3045_p10 = scmp.ne.s32.totalorder %s529_s1, %s3044_s19  ;;  %p3052_p8 = scmp.lt.s32.totalorder %s529_s1, %s529_s1 }
 0x108   : > { %p3053_p0 = scmp.lt.s32.totalorder %s3051_s2, %s3044_s19 }
 0x109   : > { %p3047_p2 = pnand %p3045_p10, %p4448_p7 }
 0x10a   : > { %p3054_p4 = por %p3053_p0, %p3052_p8 }
 0x10b   : > { %p3048_p13 = pneg %p3047_p2 }
 0x10d   : > { %p3055_p12 = pnand %p3054_p4, %p3048_p13 }
 0x10f   : > { %3058 = shalt.err (!%p3055_p12)
}
 0x110   : > { %2633 = dma.hbm_to_vmem [thread:$0]  (!%p4449_p6), %s4375_s17, 16, %s529_s1, [#allocation31]  }
 0x111   : > { %s3858_s20 = sshll.u32 %s3401_s24, 8  ;;  %s4452_s10 = sld [smem:[#allocation59_spill]] }
 0x112   : > { %s543_s21 = scalar_lea.vmem [#allocation6], %s3837_s0  ;;  %s540_s19 = scalar_lea.sflag [#allocation7], %s3600_s22 }
 0x113   : > { %s550_s26 = sshll.u32 %s543_s21, 4  ;;  %p4453_p7 = scmp.ne.s32.totalorder %s4444_s30, 0  ;;  %s3867_s26 = int_to_ptr.vmem [resolvable:$true] %s550_s26 }
 0x117   : > { %s3864_s29 = scalar_lea.hbm %s4452_s10, %s3858_s20  ;;  %s3064_s13 = scalar_lea.hbm %s4452_s10, 512 }
 0x118   : > { %s3059_s2 = scalar_lea.hbm %s3864_s29, 256  ;;  %p3065_p11 = scmp.lt.u32.totalorder %s3864_s29, %s4452_s10 }
 0x119   : > { %p3060_p12 = scmp.ne.s32.totalorder %s3864_s29, %s3059_s2  ;;  %p3066_p3 = scmp.lt.u32.totalorder %s3064_s13, %s3059_s2 }
 0x11a   : > { %p3068_p9 = scmp.lt.u32.totalorder %s3059_s2, %s3864_s29 }
 0x11b   : > { %p3062_p6 = pnand %p3060_p12, %p4453_p7  ;;  %p3067_p1 = por %p3066_p3, %p3065_p11 }
 0x11d   : > { %p3063_p5 = pneg %p3062_p6  ;;  %p3069_p10 = por %p3068_p9, %p3067_p1 }
 0x11f   : > { %p3070_p2 = pnand %p3069_p10, %p3063_p5 }
 0x121   : > { %3073 = shalt.err (!%p3070_p2)
}
 0x122   : > { %s3074_s21 = scalar_lea.vmem %s3867_s26, 256  ;;  %s3415_s1 = smov [#allocation6]  }
 0x123   : > { %p3075_p13 = scmp.ne.s32.totalorder %s3867_s26, %s3074_s21  ;;  %s3079_s3 = sshll.u32 %s3415_s1, 4  ;;  %s3080_s3 = int_to_ptr.vmem [resolvable:$false] %s3079_s3 }
 0x124   : > { %s3081_s18 = scalar_lea.vmem %s3080_s3, 512  ;;  %p3082_p4 = scmp.lt.s32.totalorder %s3867_s26, %s3080_s3 }
 0x125   : > { %p3077_p8 = pnand %p3075_p13, %p4453_p7  ;;  %p3083_p12 = scmp.lt.s32.totalorder %s3081_s18, %s3074_s21 }
 0x127   : > { %p3078_p0 = pneg %p3077_p8  ;;  %p3084_p6 = por %p3083_p12, %p3082_p4 }
 0x129   : > { %p3085_p11 = pnand %p3084_p6, %p3078_p0 }
 0x12b   : > { %3088 = shalt.err (!%p3085_p11)
}
 0x12c   : > { %p4454_p5 = scmp.ne.s32.totalorder %s4440_s12, 0  ;;  %s4455_s4 = sld [smem:[#allocation61_spill]] }
 0x12d   : > { %s581_s21 = scalar_lea.vmem [#allocation11], %s3837_s0 }
 0x12e   : > { %2637 = dma.hbm_to_vmem [thread:$0]  (!%p4454_p5), %s3864_s29, 256, %s3867_s26, %s540_s19, %s4451_s23, %s4451_s23, %s4450_s28  }
 0x12f   : > { %s588_s1 = sshll.u32 %s581_s21, 4  ;;  %s3903_s1 = int_to_ptr.vmem [resolvable:$true] %s588_s1 }
 0x132   : > { %s3900_s25 = scalar_lea.hbm %s4455_s4, %s3858_s20  ;;  %s3094_s26 = scalar_lea.hbm %s4455_s4, 512 }
 0x133   : > { %s3089_s3 = scalar_lea.hbm %s3900_s25, 256  ;;  %p3095_p10 = scmp.lt.u32.totalorder %s3900_s25, %s4455_s4 }
 0x134   : > { %p3090_p3 = scmp.ne.s32.totalorder %s3900_s25, %s3089_s3  ;;  %p3096_p2 = scmp.lt.u32.totalorder %s3094_s26, %s3089_s3 }
 0x135   : > { %p3098_p8 = scmp.lt.u32.totalorder %s3089_s3, %s3900_s25 }
 0x136   : > { %p3092_p1 = pnand %p3090_p3, %p4453_p7  ;;  %p3097_p13 = por %p3096_p2, %p3095_p10 }
 0x138   : > { %p3093_p9 = pneg %p3092_p1  ;;  %p3099_p0 = por %p3098_p8, %p3097_p13 }
 0x13a   : > { %p3100_p4 = pnand %p3099_p0, %p3093_p9 }
 0x13c   : > { %3103 = shalt.err (!%p3100_p4)
}
 0x13d   : > { %s3104_s13 = scalar_lea.vmem %s3903_s1, 256  ;;  %s3416_s21 = smov [#allocation11]  }
 0x13e   : > { %p3105_p12 = scmp.ne.s32.totalorder %s3903_s1, %s3104_s13  ;;  %s3109_s18 = sshll.u32 %s3416_s21, 4  ;;  %s3110_s18 = int_to_ptr.vmem [resolvable:$false] %s3109_s18 }
 0x13f   : > { %s3111_s29 = scalar_lea.vmem %s3110_s18, 512  ;;  %p3112_p3 = scmp.lt.s32.totalorder %s3903_s1, %s3110_s18 }
 0x140   : > { %p3107_p6 = pnand %p3105_p12, %p4453_p7  ;;  %p3113_p1 = scmp.lt.s32.totalorder %s3111_s29, %s3104_s13 }
 0x142   : > { %p3108_p11 = pneg %p3107_p6  ;;  %p3114_p10 = por %p3113_p1, %p3112_p3 }
 0x144   : > { %p3115_p2 = pnand %p3114_p10, %p3108_p11 }
 0x146   : > { %3118 = shalt.err (!%p3115_p2)
}
 0x147   : > { %s4456_s3 = scalar_lea.sflag [#allocation10], %s3636_s27  ;;  %s3935_s2 = scalar_lea.hbm %s4364_s6, %s3657_s8 }
 0x148   : > { %2643 = dma.hbm_to_vmem [thread:$0]  (!%p4454_p5), %s3900_s25, 256, %s3903_s1, %s4456_s3, %s4451_s23, %s4451_s23, %s4450_s28  }
 0x149   : > { %s618_s13 = scalar_lea.vmem [#allocation14], %s3600_s22  ;;  %s3119_s18 = scalar_lea.hbm %s3935_s2, 16 }
 0x14a   : > { %s625_s21 = sshll.u32 %s618_s13, 4  ;;  %p3120_p9 = scmp.ne.s32.totalorder %s3935_s2, %s3119_s18  ;;  %s626_s21 = int_to_ptr.vmem [resolvable:$true] %s625_s21 }
 0x14b   : > { %s3124_s25 = scalar_lea.hbm %s4364_s6, 32  ;;  %p3125_p0 = scmp.lt.u32.totalorder %s3935_s2, %s4364_s6 }
 0x14c   : > { %p3122_p13 = pnand %p3120_p9, %p4453_p7  ;;  %p3126_p4 = scmp.lt.u32.totalorder %s3124_s25, %s3119_s18 }
 0x14d   : > { %p3128_p6 = scmp.lt.u32.totalorder %s3119_s18, %s3935_s2 }
 0x14e   : > { %p3123_p8 = pneg %p3122_p13  ;;  %p3127_p12 = por %p3126_p4, %p3125_p0 }
 0x150   : > { %p3129_p11 = por %p3128_p6, %p3127_p12 }
 0x152   : > { %p3130_p3 = pnand %p3129_p11, %p3123_p8 }
 0x154   : > { %3133 = shalt.err (!%p3130_p3)
}
 0x155   : > { %s3134_s26 = scalar_lea.vmem %s626_s21, 16  ;;  %s3417_s19 = smov [#allocation14]  }
 0x156   : > { %p3135_p1 = scmp.ne.s32.totalorder %s626_s21, %s3134_s26  ;;  %s3139_s13 = sshll.u32 %s3417_s19, 4  ;;  %s3140_s13 = int_to_ptr.vmem [resolvable:$false] %s3139_s13 }
 0x157   : > { %s3141_s4 = scalar_lea.vmem %s3140_s13, 32  ;;  %p3142_p9 = scmp.lt.s32.totalorder %s626_s21, %s3140_s13 }
 0x158   : > { %p3137_p10 = pnand %p3135_p1, %p4453_p7  ;;  %p3143_p13 = scmp.lt.s32.totalorder %s3141_s4, %s3134_s26 }
 0x15a   : > { %p3138_p2 = pneg %p3137_p10  ;;  %p3144_p5 = por %p3143_p13, %p3142_p9 }
 0x15c   : > { %p3145_p0 = pnand %p3144_p5, %p3138_p2 }
 0x15e   : > { %3148 = shalt.err (!%p3145_p0)
}
 0x15f   : > { %p4457_p4 = scmp.ne.s32.totalorder %s4440_s12, 0  ;;  %s4458_s18 = scalar_lea.sflag [#allocation13], %s3636_s27 }
 0x160   : > { %s4459_s1 = sld [smem:[#allocation62_spill]]  ;;  %s653_s26 = scalar_lea.vmem [#allocation17], %s3837_s0 }
 0x161   : > { %2649 = dma.hbm_to_vmem [thread:$0]  (!%p4457_p4), %s3935_s2, 16, %s626_s21, %s4458_s18  }
 0x162   : > { %s660_s19 = sshll.u32 %s653_s26, 4  ;;  %s2369_s13 = sshll.u32 %s3600_s22, 5  ;;  %s3964_s19 = int_to_ptr.vmem [resolvable:$true] %s660_s19 }
 0x166   : > { %s3961_s3 = scalar_lea.hbm %s4459_s1, %s3858_s20  ;;  %s3154_s18 = scalar_lea.hbm %s4459_s1, 512 }
 0x167   : > { %s3149_s4 = scalar_lea.hbm %s3961_s3, 256  ;;  %p3155_p6 = scmp.lt.u32.totalorder %s3961_s3, %s4459_s1 }
 0x168   : > { %p3150_p5 = scmp.ne.s32.totalorder %s3961_s3, %s3149_s4  ;;  %p3156_p11 = scmp.lt.u32.totalorder %s3154_s18, %s3149_s4 }
 0x169   : > { %p3158_p1 = scmp.lt.u32.totalorder %s3149_s4, %s3961_s3 }
 0x16a   : > { %p3152_p8 = pnand %p3150_p5, %p4453_p7  ;;  %p3157_p3 = por %p3156_p11, %p3155_p6 }
 0x16c   : > { %p3153_p12 = pneg %p3152_p8  ;;  %p3159_p10 = por %p3158_p1, %p3157_p3 }
 0x16e   : > { %p3160_p2 = pnand %p3159_p10, %p3153_p12 }
 0x170   : > { %3163 = shalt.err (!%p3160_p2)
}
 0x171   : > { %s3164_s0 = scalar_lea.vmem %s3964_s19, 256  ;;  %s3418_s25 = smov [#allocation17]  }
 0x172   : > { %p3165_p9 = scmp.ne.s32.totalorder %s3964_s19, %s3164_s0  ;;  %s3169_s26 = sshll.u32 %s3418_s25, 4  ;;  %s3170_s26 = int_to_ptr.vmem [resolvable:$false] %s3169_s26 }
 0x173   : > { %s3171_s2 = scalar_lea.vmem %s3170_s26, 512  ;;  %p3172_p5 = scmp.lt.s32.totalorder %s3964_s19, %s3170_s26 }
 0x174   : > { %p3167_p13 = pnand %p3165_p9, %p4453_p7  ;;  %p3173_p8 = scmp.lt.s32.totalorder %s3171_s2, %s3164_s0 }
 0x176   : > { %p3168_p0 = pneg %p3167_p13  ;;  %p3174_p6 = por %p3173_p8, %p3172_p5 }
 0x178   : > { %p3175_p11 = pnand %p3174_p6, %p3168_p0 }
 0x17a   : > { %3178 = shalt.err (!%p3175_p11)
}
 0x17b   : > { %s4460_s4 = scalar_lea.sflag [#allocation16], %s3636_s27  ;;  %s2440_s21 = sshll.u32 %s3401_s24, 9 }
 0x17c   : > { %2655 = dma.hbm_to_vmem [thread:$0]  (!%p4457_p4), %s3961_s3, 256, %s3964_s19, %s4460_s4, %s4451_s23, %s4451_s23, %s4450_s28  }
 0x17d   : > { %s4461_s29 = sld [smem:[#allocation63_spill]]  ;;  %s691_s25 = scalar_lea.vmem [#allocation20], %s2369_s13 }
 0x17e   : > { %s698_s26 = sshll.u32 %s691_s25, 4  ;;  %s4001_s26 = int_to_ptr.vmem [resolvable:$true] %s698_s26 }
 0x183   : > { %s3997_s0 = scalar_lea.hbm %s4461_s29, %s2440_s21  ;;  %s3184_s19 = scalar_lea.hbm %s4461_s29, 1024 }
 0x184   : > { %s3179_s2 = scalar_lea.hbm %s3997_s0, 512  ;;  %p3185_p10 = scmp.lt.u32.totalorder %s3997_s0, %s4461_s29 }
 0x185   : > { %p3180_p12 = scmp.ne.s32.totalorder %s3997_s0, %s3179_s2  ;;  %p3186_p2 = scmp.lt.u32.totalorder %s3184_s19, %s3179_s2 }
 0x186   : > { %p3188_p13 = scmp.lt.u32.totalorder %s3179_s2, %s3997_s0 }
 0x187   : > { %p3182_p3 = pnand %p3180_p12, %p4453_p7  ;;  %p3187_p9 = por %p3186_p2, %p3185_p10 }
 0x189   : > { %p3183_p1 = pneg %p3182_p3  ;;  %p3189_p0 = por %p3188_p13, %p3187_p9 }
 0x18b   : > { %p3190_p5 = pnand %p3189_p0, %p3183_p1 }
 0x18d   : > { %3193 = shalt.err (!%p3190_p5)
}
 0x18e   : > { %s3194_s13 = scalar_lea.vmem %s4001_s26, 512  ;;  %s3419_s18 = smov [#allocation20]  }
 0x18f   : > { %p3195_p8 = scmp.ne.s32.totalorder %s4001_s26, %s3194_s13  ;;  %s3199_s20 = sshll.u32 %s3419_s18, 4  ;;  %s3200_s20 = int_to_ptr.vmem [resolvable:$false] %s3199_s20 }
 0x190   : > { %s3201_s25 = scalar_lea.vmem %s3200_s20, 1024  ;;  %p3202_p12 = scmp.lt.s32.totalorder %s4001_s26, %s3200_s20 }
 0x191   : > { %p3197_p6 = pnand %p3195_p8, %p4453_p7  ;;  %p3203_p3 = scmp.lt.s32.totalorder %s3201_s25, %s3194_s13 }
 0x193   : > { %p3198_p11 = pneg %p3197_p6  ;;  %p3204_p10 = por %p3203_p3, %p3202_p12 }
 0x195   : > { %p3205_p2 = pnand %p3204_p10, %p3198_p11 }
 0x197   : > { %3208 = shalt.err (!%p3205_p2)
}
 0x198   : > { %s4462_s2 = scalar_lea.sflag [#allocation19], %s3636_s27  ;;  %s4463_s19 = sld [smem:[#allocation64_spill]] }
 0x199   : > { %2661 = dma.hbm_to_vmem [thread:$0]  (!%p4457_p4), %s3997_s0, 512, %s4001_s26, %s4462_s2, %s4451_s23, %s4451_s23, %s4450_s28  }
 0x19a   : > { %s728_s21 = scalar_lea.vmem [#allocation23], %s3600_s22 }
 0x19b   : > { %s735_s13 = sshll.u32 %s728_s21, 4  ;;  %s736_s13 = int_to_ptr.vmem [resolvable:$true] %s735_s13 }
 0x19e   : > { %s4033_s4 = scalar_lea.hbm %s4463_s19, %s3657_s8  ;;  %s3214_s28 = scalar_lea.hbm %s4463_s19, 32 }
 0x19f   : > { %s3209_s18 = scalar_lea.hbm %s4033_s4, 16  ;;  %p3215_p0 = scmp.lt.u32.totalorder %s4033_s4, %s4463_s19 }
 0x1a0   : > { %p3210_p1 = scmp.ne.s32.totalorder %s4033_s4, %s3209_s18  ;;  %p3216_p5 = scmp.lt.u32.totalorder %s3214_s28, %s3209_s18 }
 0x1a1   : > { %p3218_p6 = scmp.lt.u32.totalorder %s3209_s18, %s4033_s4 }
 0x1a2   : > { %p3212_p9 = pnand %p3210_p1, %p4453_p7  ;;  %p3217_p8 = por %p3216_p5, %p3215_p0 }
 0x1a4   : > { %p3213_p13 = pneg %p3212_p9  ;;  %p3219_p11 = por %p3218_p6, %p3217_p8 }
 0x1a6   : > { %p3220_p12 = pnand %p3219_p11, %p3213_p13 }
 0x1a8   : > { %3223 = shalt.err (!%p3220_p12)
}
 0x1a9   : > { %s3224_s26 = scalar_lea.vmem %s736_s13, 16  ;;  %s3420_s2 = smov [#allocation23]  }
 0x1aa   : > { %p3225_p3 = scmp.ne.s32.totalorder %s736_s13, %s3224_s26  ;;  %s3229_s24 = sshll.u32 %s3420_s2, 4  ;;  %s3230_s24 = int_to_ptr.vmem [resolvable:$false] %s3229_s24 }
 0x1ab   : > { %s3231_s3 = scalar_lea.vmem %s3230_s24, 32  ;;  %p3232_p1 = scmp.lt.s32.totalorder %s736_s13, %s3230_s24 }
 0x1ac   : > { %p3227_p10 = pnand %p3225_p3, %p4453_p7  ;;  %p3233_p9 = scmp.lt.s32.totalorder %s3231_s3, %s3224_s26 }
 0x1ae   : > { %p3228_p2 = pneg %p3227_p10  ;;  %p3234_p4 = por %p3233_p9, %p3232_p1 }
 0x1b0   : > { %p3235_p0 = pnand %p3234_p4, %p3228_p2 }
 0x1b2   : > { %3238 = shalt.err (!%p3235_p0)
}
 0x1b3   : > { %p4464_p5 = scmp.ne.s32.totalorder %s4440_s12, 0  ;;  %s4465_s21 = scalar_lea.sflag [#allocation22], %s3636_s27 }
 0x1b4   : > { %s4466_s25 = sld [smem:[#allocation65_spill]]  ;;  %s745_s23 = scalar_lea.vmem [#allocation24], %s3600_s22 }
 0x1b5   : > { %2667 = dma.hbm_to_vmem [thread:$0]  (!%p4464_p5), %s4033_s4, 16, %s736_s13, %s4465_s21  }
 0x1b6   : > { %s752_s0 = sshll.u32 %s745_s23, 4  ;;  %s743_s26 = scalar_lea.sflag [#allocation25], %s3636_s27  ;;  %s753_s0 = int_to_ptr.vmem [resolvable:$true] %s752_s0 }
 0x1ba   : > { %s4059_s28 = scalar_lea.hbm %s4466_s25, %s3657_s8  ;;  %s3244_s13 = scalar_lea.hbm %s4466_s25, 32 }
 0x1bb   : > { %s3239_s2 = scalar_lea.hbm %s4059_s28, 16  ;;  %p3245_p6 = scmp.lt.u32.totalorder %s4059_s28, %s4466_s25 }
 0x1bc   : > { %p3240_p4 = scmp.ne.s32.totalorder %s4059_s28, %s3239_s2  ;;  %p3246_p11 = scmp.lt.u32.totalorder %s3244_s13, %s3239_s2 }
 0x1bd   : > { %p3248_p3 = scmp.lt.u32.totalorder %s3239_s2, %s4059_s28 }
 0x1be   : > { %p3242_p13 = pnand %p3240_p4, %p4453_p7  ;;  %p3247_p12 = por %p3246_p11, %p3245_p6 }
 0x1c0   : > { %p3243_p8 = pneg %p3242_p13  ;;  %p3249_p10 = por %p3248_p3, %p3247_p12 }
 0x1c2   : > { %p3250_p2 = pnand %p3249_p10, %p3243_p8 }
 0x1c4   : > { %3253 = shalt.err (!%p3250_p2)
}
 0x1c5   : > { %s3254_s22 = scalar_lea.vmem %s753_s0, 16  ;;  %s3421_s27 = smov [#allocation24]  }
 0x1c6   : > { %p3255_p1 = scmp.ne.s32.totalorder %s753_s0, %s3254_s22  ;;  %s3259_s21 = sshll.u32 %s3421_s27, 4  ;;  %s3260_s21 = int_to_ptr.vmem [resolvable:$false] %s3259_s21 }
 0x1c7   : > { %s3261_s18 = scalar_lea.vmem %s3260_s21, 32  ;;  %p3262_p4 = scmp.lt.s32.totalorder %s753_s0, %s3260_s21 }
 0x1c8   : > { %p3257_p9 = pnand %p3255_p1, %p4453_p7  ;;  %p3263_p13 = scmp.lt.s32.totalorder %s3261_s18, %s3254_s22 }
 0x1ca   : > { %p3258_p0 = pneg %p3257_p9  ;;  %p3264_p5 = por %p3263_p13, %p3262_p4 }
 0x1cc   : > { %p3265_p6 = pnand %p3264_p5, %p3258_p0 }
 0x1ce   : > { %3268 = shalt.err (!%p3265_p6)
}
 0x1cf   : > { %p4467_p11 = scmp.ne.s32.totalorder %s4440_s12, 0  ;;  %s4468_s20 = sld [smem:[#allocation56_spill]] }
 0x1d1   : > { %2670 = dma.hbm_to_vmem [thread:$0]  (!%p4467_p11), %s4059_s28, 16, %s753_s0, %s743_s26  }
 0x1d5   : > { %p4469_p8 = scmp.ne.s32.totalorder %s4468_s20, 0 }
 0x1d6   : > { %s4470_s23 = sld [smem:[#allocation50_spill]] (!%p4469_p8)  ;;  %s4471_s30 = sld [smem:[#allocation55_spill]] (!%p4469_p8) }
 0x1d7   : > { %761 = sbr.rel (%p4469_p8) target bundleno = 3698 (0xe72), region = 84 }
 0x1dc   : > { %s4083_s2 = sand.u32 (!%p4469_p8), 1, %s4470_s23   ;;  %p4472_p7 = scmp.ne.s32.totalorder (!%p4469_p8), %s4471_s30, 0 }
 0x1dd   : > { %s4086_s24 = sshll.u32 (!%p4469_p8), %s4083_s2, 4  ;;  %s764_s4 = scalar_lea.sflag (!%p4469_p8), [#allocation7], %s4083_s2 }
 0x1de   : > { %s767_s13 = scalar_lea.vmem [#allocation6], %s4086_s24 }
 0x1df   : > { %3340 = dma.done.wait (%p4472_p7), %s764_s4, 256  }
 0x1e0   : > { %3342 = vsyncadd (%p4472_p7), %s764_s4, 4294967040  ;;  %s4473_s12 = sld [smem:[#allocation52_spill]] }
 0x1e6   : > { %s4095_s28 = sand.u32 1, %s4473_s12  }
 0x1e7   : > { %s773_s0 = scalar_lea.sflag [#allocation10], %s4095_s28 }
 0x1e8   : > { %3344 = dma.done.wait (%p4472_p7), %s773_s0, 272  }
 0x1e9   : > { %3346 = vsyncadd (%p4472_p7), %s773_s0, 4294967024  ;;  %s790_s8 = scalar_lea.sflag [#allocation13], %s4095_s28 }
 0x1ea   : > { %3348 = dma.done.wait (%p4472_p7), %s790_s8, 32  }
 0x1eb   : > { %3350 = vsyncadd (%p4472_p7), %s790_s8, 4294967264  ;;  %s806_s21 = scalar_lea.sflag [#allocation16], %s4095_s28 }
 0x1ec   : > { %3352 = dma.done.wait (%p4472_p7), %s806_s21, 272  }
 0x1ed   : > { %3354 = vsyncadd (%p4472_p7), %s806_s21, 4294967024  ;;  %s823_s23 = scalar_lea.sflag [#allocation19], %s4095_s28 }
 0x1ee   : > { %3356 = dma.done.wait (%p4472_p7), %s823_s23, 528  }
 0x1ef   : > { %3358 = vsyncadd (%p4472_p7), %s823_s23, 4294966768  ;;  %s2379_s0 = sshll.u32 %s4083_s2, 5  ;;  %s840_s21 = scalar_lea.sflag [#allocation22], %s4095_s28 }
 0x1f0   : > { %s4125_s8 = scalar_lea.vmem [#allocation20], %s2379_s0 }
 0x1f1   : > { %3360 = dma.done.wait (%p4472_p7), %s840_s21, 32  }
 0x1f2   : > { %3362 = vsyncadd (%p4472_p7), %s840_s21, 4294967264  ;;  %s856_s23 = scalar_lea.sflag [#allocation25], %s4095_s28 }
 0x1f3   : > { %3364 = dma.done.wait (%p4472_p7), %s856_s23, 16  }
 0x1f4   : > { %3366 = vsyncadd (%p4472_p7), %s856_s23, 4294967280  ;;  %p4474_p5 = scmp.eq.s32.totalorder %s4473_s12, 0 }
 0x1f6   : > { %3368 = dma.done.wait (%p4474_p5), [#allocation25], 256   ;;  %p4475_p12 = pmov %p4474_p5 }
 0x1f7   : > { %p4476_p3 = pmov %p4474_p5 }
 0x1f8   : > { %3370 = vsyncadd (%p4475_p12), [#allocation25], 4294967040 }
 0x1f9   : > { %3372 = dma.done.wait (%p4476_p3), [#allocation28], 144   ;;  %p4477_p10 = pmov %p4476_p3 }
 0x1fa   : > { %p4478_p2 = pmov %p4476_p3 }
 0x1fb   : > { %3374 = vsyncadd (%p4477_p10), [#allocation28], 4294967152 }
 0x1fc   : > { %3376 = dma.done.wait (%p4478_p2), [#allocation31], 16   ;;  %p4479_p1 = pmov %p4478_p2 }
 0x1fd   : > { %s3422_s30 = smov [#allocation2]   ;;  %s4480_s23 = sld [smem:[#allocation58_spill]] }
 0x1fe   : > { %3378 = vsyncadd (%p4479_p1), [#allocation31], 4294967280  ;;  %s977_s28 = sshll.u32 %s3422_s30, 4  ;;  %p4482_p0 = pmov %p4479_p1  ;;  %s978_s28 = int_to_ptr.vmem [resolvable:$true] %s977_s28 }
 0x203   : > { %s4481_s27 = smov %s4480_s23  ;;  %s3269_s4 = scalar_lea.hbm %s4480_s23, 256 }
 0x204   : > { %p3270_p9 = scmp.ne.s32.totalorder %s4481_s27, %s3269_s4  ;;  %p3275_p6 = scmp.lt.u32.totalorder %s3269_s4, %s4481_s27 }
 0x206   : > { %p3271_p4 = pnand %p3270_p9, %p4482_p0 }
 0x208   : > { %p3272_p13 = pneg %p3271_p4 }
 0x20a   : > { %p3277_p11 = pnand %p3275_p6, %p3272_p13 }
 0x20c   : > { %3280 = shalt.err (!%p3277_p11)  }
 0x20d   : > { %s3281_s26 = scalar_lea.vmem %s978_s28, 256  ;;  %p4483_p7 = pmov %p4482_p0 }
 0x20e   : > { %p3282_p8 = scmp.ne.s32.totalorder %s978_s28, %s3281_s26  ;;  %p3288_p3 = scmp.lt.s32.totalorder %s978_s28, %s978_s28 }
 0x20f   : > { %p3289_p10 = scmp.lt.s32.totalorder %s3281_s26, %s3281_s26 }
 0x210   : > { %p3283_p5 = pnand %p3282_p8, %p4483_p7 }
 0x211   : > { %p3290_p2 = por %p3289_p10, %p3288_p3 }
 0x212   : > { %p3284_p12 = pneg %p3283_p5 }
 0x214   : > { %p3291_p1 = pnand %p3290_p2, %p3284_p12 }
 0x216   : > { %3294 = shalt.err (!%p3291_p1)  }
 0x217   : > { %p4484_p9 = pmov %p4482_p0 }
 0x219   : > { %2615 = dma.hbm_to_vmem [thread:$0]  (%p4484_p9), %s4481_s27, 256, %s978_s28, [#allocation3] }
 0x21a   : > { %3380 = dma.done.wait (%p4482_p0), [#allocation3], 256  ;;  %p4485_p4 = pmov %p4482_p0 }
 0x21b   : > { %v3423_v0 = vmov 0.0   ;;  %vm3424_vm0 = vmmov 0   ;;  %v2742_v1 = vld [vmem:[%s767_s13] sm:$0xff]   ;;  %v2743_v2 = vld [vmem:[%s767_s13 + $0x8] sm:$0xff]   ;;  %vm1010_vm1 = vcmask 261120   ;;  %s4486_s26 = scalar_lea.vmem [#allocation9], %s4083_s2 }
 0x21c   : > { %3382 = vsyncadd (%p4485_p4), [#allocation3], 4294967040  ;;  %2476 = vmatprep.subr.bf16.mxu0 %v3423_v0  ;;  %2480 = vmatprep.mubr.msk.bf16.mxu0 %vm3424_vm0, %v3423_v0  ;;  %v4184_v3 = vld [vmem:[#allocation2] sm:$0xff]  ;;  %v4186_v4 = vld [vmem:[#allocation2 + $0x8] sm:$0xff]  ;;  %s3425_s13 = smov 80   ;;  %s3426_s3 = smov 112  }
 0x21d   : > { %2484 = vmatprep.subr.bf16.mxu1 %v3423_v0  ;;  %2486 = vmatprep.mubr.msk.bf16.mxu1 %vm3424_vm0, %v3423_v0  ;;  %v986_v5 = vpack.c.bf16 %v4186_v4, %v4184_v3  ;;  %v2385_v6 = vld [vmem:[%s4486_s26] ss:$0 sm:$0xff]  ;;  %vm1070_vm2 = vcmask 130048   ;;  %vm1268_vm3 = vcmask 64512   ;;  %s3427_s22 = smov 96   ;;  %vm1322_vm4 = vcmask 1043456  }
 0x21e   : > { %2477 = vmatpush3.bf16.msra.mxu0 %v2742_v1  ;;  %s4487_s4 = scalar_lea.vmem [#allocation11], %s4086_s24  ;;  %s3428_s28 = smov 16   ;;  %vm1761_vm5 = vcmask 523264  }
 0x21f   : > { %2478 = vmatprep.subr.bf16.mxu0 %v3423_v0  ;;  %s4488_s30 = smov %s4487_s4  ;;  %s4489_s0 = scalar_lea.vmem [#allocation12], %s4083_s2 }
 0x220   : > { %s4490_s21 = scalar_lea.vmem [#allocation17], %s4086_s24  ;;  %s4492_s18 = scalar_lea.vmem [#allocation14], %s4083_s2 }
 0x221   : > { %s4491_s23 = smov %s4490_s21  ;;  %s4493_s24 = scalar_lea.vmem [#allocation15], %s4083_s2 }
 0x222   : > { %2479 = vmatpush3.bf16.msra.mxu0 %v2743_v2  ;;  %s4494_s20 = scalar_lea.vmem [#allocation18], %s4083_s2  ;;  %s4496_s26 = scalar_lea.vmem [#allocation23], %s4083_s2 }
 0x223   : > { %2490 = vmatprep.subr.bf16.mxu0 %v3423_v0  ;;  %p2415_p13 = scmp.ne.s32.totalorder %s4473_s12, 1 }
 0x224   : > { %vm3430_vm6 = vmmov (!%p2415_p13), 0   ;;  %vm1888_vm7 = vcmask (!%p2415_p13), 1040384  }
 0x225   : > { %2481 = vmatmul.mubr.msk.bf16.vlgmr.msra.gmra.mrb[0].mxu0 %vm1010_vm1, %v986_v5 }
 0x226   : > { %2492 = vmatprep.mubr.msk.bf16.mxu0 %vm3424_vm0, %v3423_v0 }
 0x2f8   : > { %v1048_v7 = vpop.f32.mrb[0].mxu0 }
 0x2f9   : > { %v2482_v8 = vpop.f32.mrb[1].mxu0  ;;  %v1049_v10 = vadd.f32 %v2385_v6, %v1048_v7 }
 0x2fa   : > { %v1051_v9 = vpop.f32.mrb[2].mxu0 }
 0x2fb   : > { %v1052_v11 = vadd.f32 %v2385_v6, %v1051_v9  ;;  %v2483_v12 = vpop.f32.mrb[3].mxu0  ;;  %v4200_v15 = vpack.c.bf16 %v1049_v10, %v1049_v10 }
 0x2fd   : > { %v4197_v13 = vpack.c.bf16 %v1052_v11, %v1052_v11  ;;  %v2732_v14 = vpack.i.bf16 %v1052_v11, %v1049_v10 }
 0x2ff   : > { %2733 = vrot.lane.b32.xlu0 %v2732_v14, %s3425_s13  ;;  %1118 = vrot.lane.b32.xlu1 %v4197_v13, %s3426_s3  ;;  %s4497_s13 = scalar_lea.vmem [#allocation24], %s4083_s2 }
 0x303   : > { %1068 = vrot.lane.b32.xlu0 %v4200_v15, %s3426_s3 }
 0x371   : > { %v2734_v16 = vpop.permute.xlu0 %2733  ;;  %v1119_v17 = vpop.permute.xlu1 %1118 }
 0x372   : > { %v2736_v18 = vunpack.i.h.bf16 %v2734_v16  ;;  %v2735_v19 = vunpack.i.l.bf16 %v2734_v16  ;;  %v1124_v20 = vsel %vm1070_vm2, %v1119_v17, 0 }
 0x373   : > { %2491 = vmatpush3.bf16.xpose.msra.mxu0 %v1124_v20 }
 0x374   : > { %v4204_v21 = vpack.c.bf16 %v2736_v18, %v2736_v18  ;;  %v4206_v22 = vpack.c.bf16 %v2735_v19, %v2735_v19  ;;  %2502 = vmatprep.subr.bf16.mxu0 %v3423_v0 }
 0x375   : > { %v1069_v23 = vpop.permute.xlu0 %1068 }
 0x376   : > { %1216 = vrot.lane.b32.xlu0 %v4204_v21, %s3426_s3  ;;  %1167 = vrot.lane.b32.xlu1 %v4206_v22, %s3426_s3  ;;  %v1075_v24 = vsel %vm1070_vm2, %v1069_v23, 0  ;;  %s2416_s3 = sld [smem:[#allocation5 + $0x1]] (!%p2415_p13) }
 0x377   : > { %2485 = vmatpush3.bf16.xpose.msra.mxu1 %v1075_v24 }
 0x378   : > { %2496 = vmatprep.subr.bf16.mxu1 %v3423_v0 }
 0x37a   : > { %2493 = vmatmul.mubr.msk.bf16.vlgmr.msra.gmra.mrb[4].mxu0 %vm1070_vm2, %v4197_v13 }
 0x37b   : > { %2504 = vmatprep.mubr.msk.bf16.mxu0 %vm3424_vm0, %v3423_v0 }
 0x37c   : > { %s1862_s12 = scalar_lea.vmem (!%p2415_p13), [#allocation2], %s2416_s3 }
 0x37e   : > { %2487 = vmatmul.mubr.msk.bf16.vlgmr.msra.gmra.mrb[0].mxu1 %vm1070_vm2, %v4200_v15 }
 0x37f   : > { %2498 = vmatprep.mubr.msk.bf16.mxu1 %vm3424_vm0, %v3423_v0 }
 0x3e8   : > { %v1217_v25 = vpop.permute.xlu0 %1216  ;;  %v1168_v26 = vpop.permute.xlu1 %1167 }
 0x3e9   : > { %v1222_v27 = vsel %vm1070_vm2, %v1217_v25, 0  ;;  %v1173_v28 = vsel %vm1070_vm2, %v1168_v26, 0 }
 0x3ea   : > { %2497 = vmatpush3.bf16.xpose.msra.mxu1 %v1173_v28  ;;  %2503 = vmatpush3.bf16.xpose.msra.mxu0 %v1222_v27 }
 0x3eb   : > { %2508 = vmatprep.subr.bf16.mxu1 %v3423_v0  ;;  %2514 = vmatprep.subr.bf16.mxu0 %v3423_v0 }
 0x3f1   : > { %2499 = vmatmul.mubr.msk.bf16.vlgmr.msra.gmra.mrb[4].mxu1 %vm1070_vm2, %v4206_v22  ;;  %2505 = vmatmul.mubr.msk.bf16.vlgmr.msra.gmra.mrb[8].mxu0 %vm1070_vm2, %v4204_v21 }
 0x3f2   : > { %2510 = vmatprep.mubr.msk.bf16.mxu1 %vm3424_vm0, %v3423_v0  ;;  %2516 = vmatprep.mubr.msk.bf16.mxu0 %vm3424_vm0, %v3423_v0 }
 0x44d   : > { %v1160_v29 = vpop.f32.mrb[4].mxu0 }
 0x44e   : > { %v1265_v30 = vmul.f32 0.25, %v1160_v29  ;;  %v2494_v31 = vpop.f32.mrb[5].mxu0 }
 0x44f   : > { %v1163_v32 = vpop.f32.mrb[6].mxu0 }
 0x450   : > { %v2495_v33 = vpop.f32.mrb[7].mxu0  ;;  %v1272_v34 = vsel %vm1268_vm3, %v1265_v30, -inf }
 0x451   : > { %v1111_v35 = vpop.f32.mrb[0].mxu1  ;;  %1273 = vmax.xlane.f32.xlu0 %v1272_v34 }
 0x452   : > { %v1264_v36 = vmul.f32 0.25, %v1111_v35  ;;  %v2488_v37 = vpop.f32.mrb[1].mxu1 }
 0x453   : > { %v1114_v38 = vpop.f32.mrb[2].mxu1 }
 0x454   : > { %v2489_v39 = vpop.f32.mrb[3].mxu1  ;;  %v1269_v40 = vsel %vm1268_vm3, %v1264_v36, -inf }
 0x455   : > { %1270 = vmax.xlane.f32.xlu1 %v1269_v40 }
 0x4c4   : > { %v1209_v41 = vpop.f32.mrb[4].mxu1  ;;  %v1258_v42 = vpop.f32.mrb[8].mxu0 }
 0x4c5   : > { %v1266_v43 = vmul.f32 0.25, %v1209_v41  ;;  %v1267_v44 = vmul.f32 0.25, %v1258_v42  ;;  %v2500_v45 = vpop.f32.mrb[5].mxu1  ;;  %v2506_v46 = vpop.f32.mrb[9].mxu0 }
 0x4c6   : > { %v1212_v47 = vpop.f32.mrb[6].mxu1  ;;  %v1261_v48 = vpop.f32.mrb[10].mxu0  ;;  %v2745_v45 = vld [vmem:[%s4488_s30 + $0x8] sm:$0xff]   ;;  %s2420_s30 = sld [smem:[#allocation5 + $0x4]] (!%p2415_p13) }
 0x4c7   : > { %v2501_v49 = vpop.f32.mrb[7].mxu1  ;;  %v2507_v50 = vpop.f32.mrb[11].mxu0  ;;  %v1275_v51 = vsel %vm1268_vm3, %v1266_v43, -inf  ;;  %v1278_v52 = vsel %vm1268_vm3, %v1267_v44, -inf }
 0x4c8   : > { %1276 = vmax.xlane.f32.xlu0 %v1275_v51  ;;  %1279 = vmax.xlane.f32.xlu1 %v1278_v52 }
 0x4d9   : > { %1366 = vrot.lane.b32.xlu1 %v4197_v13, %s3427_s22 }
 0x4de   : > { %1317 = vrot.lane.b32.xlu0 %v4200_v15, %s3427_s22  ;;  %v1274_v53 = vpop.xlane.xlu0 %1273 }
 0x4df   : > { %v1282_v55 = vsub.f32 %v1265_v30, %v1274_v53 }
 0x4e1   : > { %v1287_v57 = vmul.f32 1.442695, %v1282_v55 }
 0x4e2   : > { %v1271_v54 = vpop.xlane.xlu1 %1270 }
 0x4e3   : > { %v1281_v56 = vsub.f32 %v1264_v36, %v1271_v54  ;;  %2752 = vpow2.f32 %v1287_v57  ;;  %v2744_v36 = vld [vmem:[%s4487_s4] sm:$0xff]   ;;  %s2418_s4 = sld [smem:[#allocation5 + $0x3]] (!%p2415_p13) }
 0x4e5   : > { %v1285_v58 = vmul.f32 1.442695, %v1281_v56 }
 0x4e7   : > { %2754 = vpow2.f32 %v1285_v58 }
 0x4ed   : > { %v2753_v59 = vpop.eup %2752 }
 0x4ee   : > { %v1296_v62 = vsel %vm1268_vm3, %v2753_v59, 0.0 }
 0x4f1   : > { %v2755_v60 = vpop.eup %2754 }
 0x4f2   : > { %v1293_v61 = vsel %vm1268_vm3, %v2755_v60, 0.0 }
 0x4fd   : > { %1294 = vadd.xlane.f32.xlu0 %v1293_v61  ;;  %1297 = vadd.xlane.f32.xlu1 %v1296_v62  ;;  %v2397_v61 = vld [vmem:[%s4489_s0] ss:$0 sm:$0xff] }
 0x555   : > { %v1277_v63 = vpop.xlane.xlu0 %1276  ;;  %v1280_v1 = vpop.xlane.xlu1 %1279 }
 0x556   : > { %v1283_v2 = vsub.f32 %v1266_v43, %v1277_v63  ;;  %v1284_v5 = vsub.f32 %v1267_v44, %v1280_v1 }
 0x558   : > { %v1289_v6 = vmul.f32 1.442695, %v1283_v2  ;;  %v1291_v7 = vmul.f32 1.442695, %v1284_v5 }
 0x559   : > { %v1318_v8 = vpop.permute.xlu0 %1317  ;;  %v1367_v9 = vpop.permute.xlu1 %1366 }
 0x55a   : > { %2756 = vpow2.f32 %v1289_v6  ;;  %v1324_v10 = vsel %vm1322_vm4, %v1318_v8, 0  ;;  %v1372_v11 = vsel %vm1322_vm4, %v1367_v9, 0 }
 0x55b   : > { %2758 = vpow2.f32 %v1291_v7  ;;  %2509 = vmatpush3.bf16.msra.mxu1 %v1324_v10  ;;  %2515 = vmatpush3.bf16.msra.mxu0 %v1372_v11 }
 0x55c   : > { %2520 = vmatprep.subr.bf16.mxu1 %v3423_v0  ;;  %2526 = vmatprep.subr.bf16.mxu0 %v3423_v0 }
 0x564   : > { %v2757_v12 = vpop.eup %2756 }
 0x565   : > { %v2759_v13 = vpop.eup %2758  ;;  %v1299_v14 = vsel %vm1268_vm3, %v2757_v12, 0.0 }
 0x566   : > { %1300 = vadd.xlane.f32.xlu0 %v1299_v14  ;;  %v1302_v15 = vsel %vm1268_vm3, %v2759_v13, 0.0 }
 0x567   : > { %1303 = vadd.xlane.f32.xlu1 %v1302_v15 }
 0x578   : > { %1414 = vrot.lane.b32.xlu1 %v4206_v22, %s3427_s22 }
 0x57c   : > { %1462 = vrot.lane.b32.xlu0 %v4204_v21, %s3427_s22  ;;  %s2417_s22 = sld [smem:[#allocation5 + $0x2]] (!%p2415_p13) }
 0x58a   : > { %v1295_v16 = vpop.xlane.xlu0 %1294  ;;  %v1298_v17 = vpop.xlane.xlu1 %1297 }
 0x58b   : > { %2760 = vrcp.f32 %v1295_v16 }
 0x58c   : > { %2762 = vrcp.f32 %v1298_v17 }
 0x595   : > { %v2761_v18 = vpop.eup %2760 }
 0x596   : > { %v2763_v19 = vpop.eup %2762  ;;  %v1309_v20 = vmul.f32 %v2761_v18, %v2755_v60 }
 0x597   : > { %v1310_v23 = vmul.f32 %v2763_v19, %v2753_v59 }
 0x598   : > { %v1313_v24 = vpack.c.bf16 %v1309_v20, %v1309_v20  ;;  %v2747_v20 = vld [vmem:[%s4491_s23 + $0x8] sm:$0xff]   ;;  %s2187_s23 = scalar_lea.vmem (!%p2415_p13), [#allocation2], %s2418_s4 }
 0x599   : > { %v1314_v25 = vpack.c.bf16 %v1310_v23, %v1310_v23 }
 0x59a   : > { %2511 = vmatmul.mubr.msk.bf16.vlgmr.msra.gmra.mrb[8].mxu1 %vm1268_vm3, %v1313_v24 }
 0x59b   : > { %2517 = vmatmul.mubr.msk.bf16.vlgmr.msra.gmra.mrb[12].mxu0 %vm1268_vm3, %v1314_v25  ;;  %2522 = vmatprep.mubr.msk.bf16.mxu1 %vm3424_vm0, %v3423_v0 }
 0x59c   : > { %2528 = vmatprep.mubr.msk.bf16.mxu0 %vm3424_vm0, %v3423_v0 }
 0x5f3   : > { %v1301_v21 = vpop.xlane.xlu0 %1300 }
 0x5f4   : > { %2764 = vrcp.f32 %v1301_v21  ;;  %v1304_v22 = vpop.xlane.xlu1 %1303 }
 0x5f5   : > { %2766 = vrcp.f32 %v1304_v22 }
 0x5f7   : > { %v1463_v26 = vpop.permute.xlu0 %1462 }
 0x5f8   : > { %v1468_v27 = vsel %vm1322_vm4, %v1463_v26, 0  ;;  %v1415_v28 = vpop.permute.xlu1 %1414 }
 0x5f9   : > { %v1420_v29 = vsel %vm1322_vm4, %v1415_v28, 0  ;;  %2527 = vmatpush3.bf16.msra.mxu0 %v1468_v27 }
 0x5fa   : > { %2521 = vmatpush3.bf16.msra.mxu1 %v1420_v29  ;;  %2540 = vmatprep.subr.bf16.mxu0 %v3423_v0  ;;  %v2401_v29 = vld [vmem:[%s4492_s18] ss:$0 sm:$0xff]  ;;  %s2189_s18 = scalar_lea.vmem (!%p2415_p13), [#allocation2], %s2420_s30 }
 0x5fb   : > { %2532 = vmatprep.subr.bf16.mxu1 %v3423_v0 }
 0x5fe   : > { %v2765_v30 = vpop.eup %2764 }
 0x5ff   : > { %v2767_v31 = vpop.eup %2766  ;;  %v1311_v32 = vmul.f32 %v2765_v30, %v2757_v12 }
 0x600   : > { %v1312_v33 = vmul.f32 %v2767_v31, %v2759_v13 }
 0x601   : > { %v1315_v34 = vpack.c.bf16 %v1311_v32, %v1311_v32 }
 0x602   : > { %v1316_v35 = vpack.c.bf16 %v1312_v33, %v1312_v33  ;;  %v2402_v33 = vld [vmem:[%s4493_s24] ss:$0 sm:$0xff] }
 0x603   : > { %2523 = vmatmul.mubr.msk.bf16.vlgmr.msra.gmra.mrb[12].mxu1 %vm1268_vm3, %v1315_v34 }
 0x604   : > { %2529 = vmatmul.mubr.msk.bf16.vlgmr.msra.gmra.mrb[16].mxu0 %vm1268_vm3, %v1316_v35  ;;  %2536 = vmatprep.mubr.msk.bf16.mxu1 %vm3424_vm0, %v3423_v0 }
 0x605   : > { %2544 = vmatprep.mubr.msk.bf16.mxu0 %vm3424_vm0, %v3423_v0  ;;  %2533 = vmatpush3.bf16.msra.mxu1 %v2744_v36 }
 0x606   : > { %2534 = vmatprep.subr.bf16.mxu1 %v3423_v0 }
 0x609   : > { %2535 = vmatpush3.bf16.msra.mxu1 %v2745_v45 }
 0x60a   : > { %2548 = vmatprep.subr.bf16.mxu1 %v3423_v0 }
 0x66d   : > { %v1360_v37 = vpop.f32.mrb[8].mxu1 }
 0x66e   : > { %v1408_v38 = vpop.f32.mrb[12].mxu0  ;;  %v2512_v39 = vpop.f32.mrb[9].mxu1 }
 0x66f   : > { %v2518_v40 = vpop.f32.mrb[13].mxu0  ;;  %v1363_v41 = vpop.f32.mrb[10].mxu1  ;;  %v2749_v39 = vld [vmem:[%s4125_s8 + $0x8] sm:$0xff]  }
 0x670   : > { %v1411_v42 = vpop.f32.mrb[14].mxu0  ;;  %v2513_v43 = vpop.f32.mrb[11].mxu1  ;;  %v2750_v40 = vld [vmem:[%s4125_s8 + $0x10] sm:$0xff]   ;;  %v2751_v41 = vld [vmem:[%s4125_s8 + $0x18] sm:$0xff]  }
 0x671   : > { %v2519_v44 = vpop.f32.mrb[15].mxu0  ;;  %v2403_v42 = vld [vmem:[%s4494_s20] ss:$0 sm:$0xff] }
 0x6d6   : > { %v1456_v46 = vpop.f32.mrb[12].mxu1 }
 0x6d7   : > { %v1504_v47 = vpop.f32.mrb[16].mxu0  ;;  %v2524_v48 = vpop.f32.mrb[13].mxu1 }
 0x6d8   : > { %v2737_v49 = vpack.i.bf16 %v1504_v47, %v1456_v46  ;;  %v2530_v50 = vpop.f32.mrb[17].mxu0  ;;  %v1459_v51 = vpop.f32.mrb[14].mxu1 }
 0x6d9   : > { %v1507_v52 = vpop.f32.mrb[18].mxu0  ;;  %v2525_v53 = vpop.f32.mrb[15].mxu1 }
 0x6da   : > { %2738 = vrot.lane.b32.xlu1 %v2737_v49, %s3428_s28  ;;  %v2531_v54 = vpop.f32.mrb[19].mxu0  ;;  %s2422_s28 = sld [smem:[#allocation5 + $0x5]] (!%p2415_p13) }
 0x6e0   : > { %s2191_s24 = scalar_lea.vmem (!%p2415_p13), [#allocation2], %s2422_s28 }
 0x74c   : > { %v2739_v55 = vpop.permute.xlu1 %2738 }
 0x74d   : > { %v2741_v56 = vunpack.i.h.bf16 %v2739_v55  ;;  %v2740_v57 = vunpack.i.l.bf16 %v2739_v55 }
 0x74f   : > { %v1519_v58 = vsel %vm1070_vm2, %v1408_v38, %v2741_v56  ;;  %v1518_v59 = vsel %vm1070_vm2, %v1360_v37, %v2740_v57  ;;  %v2748_v38 = vld [vmem:[%s4125_s8] sm:$0xff]   ;;  %s4495_s8 = scalar_lea.vmem [#allocation21], %s4083_s2  ;;  %s1858_s2 = sld [smem:[#allocation5]] (!%p2415_p13) }
 0x750   : > { %v1520_v60 = vpack.c.bf16 %v1519_v58, %v1518_v59 }
 0x752   : > { %2537 = vmatmul.mubr.msk.bf16.vlgmr.msra.gmra.mrb[16].mxu1 %vm1010_vm1, %v1520_v60 }
 0x753   : > { %2556 = vmatprep.mubr.msk.bf16.mxu1 %vm3424_vm0, %v3423_v0  ;;  %2549 = vmatpush3.bf16.msra.mxu1 %v2748_v38 }
 0x754   : > { %2550 = vmatprep.subr.bf16.mxu1 %v3423_v0 }
 0x755   : > { %s1859_s0 = scalar_lea.vmem (!%p2415_p13), [#allocation2], %s1858_s2 }
 0x757   : > { %2551 = vmatpush3.bf16.msra.mxu1 %v2749_v39 }
 0x758   : > { %2552 = vmatprep.subr.bf16.mxu1 %v3423_v0 }
 0x75b   : > { %2553 = vmatpush3.bf16.msra.mxu1 %v2750_v40 }
 0x75c   : > { %2554 = vmatprep.subr.bf16.mxu1 %v3423_v0 }
 0x75f   : > { %2555 = vmatpush3.bf16.msra.mxu1 %v2751_v41  ;;  %v2780_v41 = vld [vmem:[#allocation26] sm:$0xff] (!%p2415_p13)  }
 0x825   : > { %v1581_v62 = vpop.f32.mrb[16].mxu1 }
 0x826   : > { %v1582_v63 = vadd.f32 %v2397_v61, %v1581_v62  ;;  %v2538_v1 = vpop.f32.mrb[17].mxu1 }
 0x827   : > { %v1584_v2 = vpop.f32.mrb[18].mxu1 }
 0x828   : > { %v1585_v5 = vadd.f32 %v2397_v61, %v1584_v2  ;;  %v2539_v6 = vpop.f32.mrb[19].mxu1  ;;  %v1588_v7 = vadd.f32 %v1582_v63, %v4184_v3 }
 0x829   : > { %v2407_v6 = vld [vmem:[%s4495_s8] ss:$0 sm:$0xff] }
 0x82a   : > { %v1592_v8 = vsel %vm1010_vm1, %v1588_v7, 0.0  ;;  %v1589_v9 = vadd.f32 %v1585_v5, %v4186_v4  ;;  %v2746_v4 = vld [vmem:[%s4490_s21] sm:$0xff]   ;;  %s1865_s21 = scalar_lea.vmem (!%p2415_p13), [#allocation2], %s2417_s22 }
 0x82b   : > { %1593 = vadd.xlane.f32.xlu0 %v1592_v8  ;;  %2541 = vmatpush3.bf16.msra.mxu0 %v2746_v4 }
 0x82c   : > { %v1595_v10 = vsel %vm1010_vm1, %v1589_v9, 0.0  ;;  %2542 = vmatprep.subr.bf16.mxu0 %v3423_v0 }
 0x82d   : > { %1596 = vadd.xlane.f32.xlu1 %v1595_v10 }
 0x82f   : > { %2543 = vmatpush3.bf16.msra.mxu0 %v2747_v20 }
 0x8b8   : > { %v1594_v11 = vpop.xlane.xlu0 %1593 }
 0x8b9   : > { %v1599_v12 = vmul.f32 0.03125, %v1594_v11 }
 0x8ba   : > { %v1597_v13 = vpop.xlane.xlu1 %1596 }
 0x8bb   : > { %v1601_v14 = vsub.f32 %v1588_v7, %v1599_v12  ;;  %v1600_v15 = vmul.f32 0.03125, %v1597_v13 }
 0x8bd   : > { %v1602_v16 = vsub.f32 %v1589_v9, %v1600_v15  ;;  %v1603_v17 = vmul.f32 %v1601_v14, %v1601_v14 }
 0x8bf   : > { %v1605_v18 = vsel %vm1010_vm1, %v1603_v17, 0.0  ;;  %v1604_v3 = vmul.f32 %v1602_v16, %v1602_v16 }
 0x8c0   : > { %1606 = vadd.xlane.f32.xlu0 %v1605_v18 }
 0x8c1   : > { %v1608_v19 = vsel %vm1010_vm1, %v1604_v3, 0.0 }
 0x8c4   : > { %1609 = vadd.xlane.f32.xlu0 %v1608_v19 }
 0x94d   : > { %v1607_v23 = vpop.xlane.xlu0 %1606 }
 0x94e   : > { %v1611_v24 = vmul.f32 0.03125, %v1607_v23 }
 0x950   : > { %v1613_v25 = vadd.f32 1e-12, %v1611_v24 }
 0x951   : > { %v1610_v21 = vpop.xlane.xlu0 %1609 }
 0x952   : > { %2768 = vrsqrt.f32 %v1613_v25  ;;  %v1612_v22 = vmul.f32 0.03125, %v1610_v21 }
 0x954   : > { %v1614_v26 = vadd.f32 1e-12, %v1612_v22 }
 0x956   : > { %2770 = vrsqrt.f32 %v1614_v26 }
 0x95c   : > { %v2769_v27 = vpop.eup %2768 }
 0x95d   : > { %v1617_v28 = vmul.f32 %v2769_v27, %v1601_v14 }
 0x95f   : > { %v1625_v31 = vmul.f32 %v2401_v29, %v1617_v28 }
 0x960   : > { %v2771_v30 = vpop.eup %2770 }
 0x961   : > { %v1618_v32 = vmul.f32 %v2771_v30, %v1602_v16  ;;  %v1633_v35 = vadd.f32 %v2402_v33, %v1625_v31 }
 0x963   : > { %v1626_v34 = vmul.f32 %v2401_v29, %v1618_v32  ;;  %v2413_v32 = vld [vmem:[%s4496_s26] ss:$0 sm:$0xff] }
 0x965   : > { %v1634_v36 = vadd.f32 %v2402_v33, %v1626_v34 }
 0x967   : > { %v1635_v37 = vpack.c.bf16 %v1634_v36, %v1633_v35 }
 0x969   : > { %2545 = vmatmul.mubr.msk.bf16.vlgmr.msra.gmra.mrb[20].mxu0 %vm1010_vm1, %v1635_v37 }
 0xa3c   : > { %v1696_v43 = vpop.f32.mrb[20].mxu0 }
 0xa3d   : > { %v1697_v44 = vadd.f32 %v2403_v42, %v1696_v43  ;;  %v2546_v45 = vpop.f32.mrb[21].mxu0  ;;  %v2781_v43 = vld [vmem:[#allocation26 + $0x8] sm:$0xff] (!%p2415_p13)  }
 0xa3e   : > { %v1699_v46 = vpop.f32.mrb[22].mxu0 }
 0xa3f   : > { %v1703_v47 = vmul.f32 %v1697_v44, %v1697_v44  ;;  %v1700_v48 = vadd.f32 %v2403_v42, %v1699_v46  ;;  %v2547_v49 = vpop.f32.mrb[23].mxu0  ;;  %v3429_v42 = vmov (!%p2415_p13), 0.0  }
 0xa40   : > { %2560 = vmatprep.subr.bf16.mxu0 (!%p2415_p13), %v3429_v42  ;;  %2568 = vmatprep.subr.bf16.mxu1 (!%p2415_p13), %v3429_v42 }
 0xa41   : > { %v1705_v50 = vmul.f32 %v1703_v47, %v1697_v44  ;;  %v1704_v51 = vmul.f32 %v1700_v48, %v1700_v48  ;;  %2561 = vmatpush3.bf16.msra.mxu0 (!%p2415_p13), %v2780_v41  ;;  %2564 = vmatprep.mubr.msk.bf16.mxu0 (!%p2415_p13), %vm3430_vm6, %v3429_v42 }
 0xa42   : > { %2562 = vmatprep.subr.bf16.mxu0 (!%p2415_p13), %v3429_v42 }
 0xa43   : > { %v1707_v52 = vmul.f32 0.044715, %v1705_v50  ;;  %v1706_v53 = vmul.f32 %v1704_v51, %v1700_v48 }
 0xa45   : > { %v1709_v54 = vadd.f32 %v1707_v52, %v1697_v44  ;;  %v1708_v55 = vmul.f32 0.044715, %v1706_v53  ;;  %2563 = vmatpush3.bf16.msra.mxu0 (!%p2415_p13), %v2781_v43 }
 0xa47   : > { %v1711_v56 = vmul.f32 0.7978846, %v1709_v54  ;;  %v1710_v0 = vadd.f32 %v1708_v55, %v1700_v48 }
 0xa49   : > { %2772 = vtanh.f32 %v1711_v56  ;;  %v1712_v57 = vmul.f32 0.7978846, %v1710_v0 }
 0xa4b   : > { %2774 = vtanh.f32 %v1712_v57 }
 0xa53   : > { %v2773_v58 = vpop.eup %2772 }
 0xa54   : > { %v1715_v59 = vadd.f32 1.0, %v2773_v58  ;;  %v2782_v58 = vld [vmem:[#allocation29] sm:$0xff] (!%p2415_p13)  }
 0xa55   : > { %v2775_v60 = vpop.eup %2774 }
 0xa56   : > { %v1717_v61 = vmul.f32 0.5, %v1715_v59  ;;  %v1716_v62 = vadd.f32 1.0, %v2775_v60  ;;  %v2424_v59 = vld [vmem:[#allocation27] ss:$0 sm:$0xff] (!%p2415_p13) }
 0xa58   : > { %v1718_v63 = vmul.f32 0.5, %v1716_v62  ;;  %v1719_v1 = vmul.f32 %v1717_v61, %v1697_v44 }
 0xa5a   : > { %v1720_v2 = vmul.f32 %v1718_v63, %v1700_v48 }
 0xa5c   : > { %v1721_v5 = vpack.c.bf16 %v1720_v2, %v1719_v1 }
 0xa5e   : > { %2557 = vmatmul.mubr.msk.bf16.vlgmr.msra.gmra.mrb[20].mxu1 %vm1761_vm5, %v1721_v5 }
 0xa5f   : > { %2570 = vmatprep.mubr.msk.bf16.mxu1 (!%p2415_p13), %vm3430_vm6, %v3429_v42  ;;  %2569 = vmatpush3.bf16.msra.mxu1 (!%p2415_p13), %v2782_v58 }
 0xb31   : > { %v1799_v7 = vpop.f32.mrb[20].mxu1 }
 0xb32   : > { %v1800_v8 = vadd.f32 %v2407_v6, %v1799_v7  ;;  %v2558_v9 = vpop.f32.mrb[21].mxu1 }
 0xb33   : > { %v1802_v10 = vpop.f32.mrb[22].mxu1 }
 0xb34   : > { %v1803_v11 = vadd.f32 %v2407_v6, %v1802_v10  ;;  %v2559_v12 = vpop.f32.mrb[23].mxu1  ;;  %v1806_v13 = vadd.f32 %v1800_v8, %v1633_v35  ;;  %v2414_v35 = vld [vmem:[%s4497_s13] ss:$0 sm:$0xff]  ;;  %v2428_v6 = vld [vmem:[#allocation30] ss:$0 sm:$0xff] (!%p2415_p13) }
 0xb36   : > { %v1810_v14 = vsel %vm1010_vm1, %v1806_v13, 0.0  ;;  %v1807_v15 = vadd.f32 %v1803_v11, %v1634_v36 }
 0xb37   : > { %1811 = vadd.xlane.f32.xlu1 %v1810_v14 }
 0xb38   : > { %v1813_v16 = vsel %vm1010_vm1, %v1807_v15, 0.0 }
 0xb39   : > { %1814 = vadd.xlane.f32.xlu0 %v1813_v16 }
 0xbc4   : > { %v1812_v17 = vpop.xlane.xlu1 %1811 }
 0xbc5   : > { %v1816_v18 = vmul.f32 0.03125, %v1812_v17 }
 0xbc6   : > { %v1815_v3 = vpop.xlane.xlu0 %1814 }
 0xbc7   : > { %v1818_v19 = vsub.f32 %v1806_v13, %v1816_v18  ;;  %v1817_v4 = vmul.f32 0.03125, %v1815_v3 }
 0xbc9   : > { %v1819_v20 = vsub.f32 %v1807_v15, %v1817_v4  ;;  %v1820_v23 = vmul.f32 %v1818_v19, %v1818_v19 }
 0xbcb   : > { %v1822_v24 = vsel %vm1010_vm1, %v1820_v23, 0.0  ;;  %v1821_v25 = vmul.f32 %v1819_v20, %v1819_v20 }
 0xbcc   : > { %1823 = vadd.xlane.f32.xlu1 %v1822_v24 }
 0xbcd   : > { %v1825_v21 = vsel %vm1010_vm1, %v1821_v25, 0.0 }
 0xbce   : > { %1826 = vadd.xlane.f32.xlu0 %v1825_v21 }
 0xc59   : > { %v1824_v22 = vpop.xlane.xlu1 %1823 }
 0xc5a   : > { %v1828_v26 = vmul.f32 0.03125, %v1824_v22 }
 0xc5b   : > { %v1827_v27 = vpop.xlane.xlu0 %1826 }
 0xc5c   : > { %v1830_v28 = vadd.f32 1e-12, %v1828_v26  ;;  %v1829_v29 = vmul.f32 0.03125, %v1827_v27 }
 0xc5e   : > { %2776 = vrsqrt.f32 %v1830_v28  ;;  %v1831_v30 = vadd.f32 1e-12, %v1829_v29 }
 0xc60   : > { %2778 = vrsqrt.f32 %v1831_v30 }
 0xc68   : > { %v2777_v31 = vpop.eup %2776 }
 0xc69   : > { %v1834_v33 = vmul.f32 %v2777_v31, %v1818_v19 }
 0xc6a   : > { %v2779_v34 = vpop.eup %2778 }
 0xc6b   : > { %v1842_v36 = vmul.f32 %v2413_v32, %v1834_v33  ;;  %v1835_v37 = vmul.f32 %v2779_v34, %v1819_v20  ;;  %1857 = sbr.rel (%p2415_p13) target bundleno = 3664 (0xe50), region = 160 }
 0xc6d   : > { %v1850_v38 = vadd.f32 %v2414_v35, %v1842_v36  ;;  %v1843_v39 = vmul.f32 %v2413_v32, %v1835_v37 }
 0xc6f   : > { %1852 = vst.msk [vmem:[#allocation2] sm:$0xff] %vm1010_vm1, %v1850_v38  ;;  %v1851_v40 = vadd.f32 %v2414_v35, %v1843_v39 }
 0xc71   : > { %1853 = vst.msk [vmem:[#allocation2 + $0x8] sm:$0xff] %vm1010_vm1, %v1851_v40 }
 0xc78   : > { %v1860_v44 = vld [vmem:[%s1859_s0] sm:$0x1]  ;;  %v2419_v48 = vld [vmem:[%s2187_s23 + $0x8] sm:$0x1] }
 0xc79   : > { %v1863_v45 = vld [vmem:[%s1862_s12] sm:$0x1]  ;;  %v2421_v49 = vld [vmem:[%s2189_s18 + $0x8] sm:$0x1] }
 0xc7a   : > { %v1866_v46 = vld [vmem:[%s1865_s21] sm:$0x1]  ;;  %v1867_v47 = vadd.f32 %v1863_v45, %v1860_v44  ;;  %v2423_v50 = vld [vmem:[%s2191_s24 + $0x8] sm:$0x1]  ;;  %v1882_v52 = vadd.f32 %v2421_v49, %v2419_v48 }
 0xc7c   : > { %v1868_v51 = vadd.f32 %v1867_v47, %v1866_v46  ;;  %v1883_v53 = vadd.f32 %v2423_v50, %v1882_v52 }
 0xc7e   : > { %v1869_v54 = vmul.f32 0.33333334, %v1868_v51  ;;  %v1884_v55 = vmul.f32 0.33333334, %v1883_v53 }
 0xc80   : > { %v1886_v56 = vrot.slane %v1884_v55, 7 }
 0xc82   : > { %v1889_v0 = vsel %vm1888_vm7, %v1869_v54, %v1886_v56 }
 0xc83   : > { %v1890_v57 = vpack.c.bf16 %v1889_v0, %v1889_v0 }
 0xc85   : > { %2565 = vmatmul.mubr.msk.bf16.vlgmr.msra.gmra.mrb[0].mxu0 %vm1010_vm1, %v1890_v57 }
 0xd58   : > { %v1951_v60 = vpop.f32.mrb[0].mxu0 }
 0xd59   : > { %v1952_v61 = vadd.f32 %v2424_v59, %v1951_v60  ;;  %v2566_v62 = vpop.f32.mrb[1].mxu0 }
 0xd5a   : > { %v1954_v63 = vpop.f32.mrb[2].mxu0 }
 0xd5b   : > { %v1957_v1 = vmax.f32 %v1952_v61, 0.0  ;;  %v2567_v2 = vpop.f32.mrb[3].mxu0 }
 0xd5d   : > { %v1958_v5 = vpack.c.bf16 %v1957_v1, %v1957_v1 }
 0xd5f   : > { %2571 = vmatmul.mubr.msk.bf16.vlgmr.msra.gmra.mrb[0].mxu1 %vm1070_vm2, %v1958_v5 }
 0xe32   : > { %v2011_v7 = vpop.f32.mrb[0].mxu1 }
 0xe33   : > { %v2012_v8 = vadd.f32 %v2428_v6, %v2011_v7  ;;  %v2572_v9 = vpop.f32.mrb[1].mxu1 }
 0xe34   : > { %v2014_v10 = vpop.f32.mrb[2].mxu1 }
 0xe35   : > { %v2431_v11 = vmul.f32 -1.442695, %v2012_v8  ;;  %v2573_v12 = vpop.f32.mrb[3].mxu1 }
 0xe37   : > { %2783 = vpow2.f32 %v2431_v11 }
 0xe41   : > { %v2784_v13 = vpop.eup %2783 }
 0xe42   : > { %v2020_v14 = vadd.f32 1.0, %v2784_v13 }
 0xe44   : > { %2785 = vrcp.f32 %v2020_v14 }
 0xe4e   : > { %v2786_v15 = vpop.eup %2785 }
 0xe4f   : > { %2023 = vst [vmem:[#allocation32] sm:$0x3] %v2786_v15 }
 0xe50 PF: > { %s4498_s20 = sld [smem:[#allocation52_spill]]  ;;  %s3431_s8 = smov [#allocation32]  }
 0xe51   : > { %s2031_s26 = sshll.u32 %s3431_s8, 4  ;;  %s2032_s26 = int_to_ptr.vmem [resolvable:$true] %s2031_s26 }
 0xe52   : > { %s3295_s13 = scalar_lea.vmem %s2032_s26, 32  ;;  %p3302_p5 = scmp.lt.s32.totalorder %s2032_s26, %s2032_s26 }
 0xe53   : > { %p3296_p11 = scmp.ne.s32.totalorder %s2032_s26, %s3295_s13  ;;  %p3303_p12 = scmp.lt.s32.totalorder %s3295_s13, %s3295_s13 }
 0xe55   : > { %p3304_p3 = por %p3303_p12, %p3302_p5 }
 0xe56   : > { %p2681_p6 = scmp.eq.s32.totalorder %s4498_s20, 1 }
 0xe58   : > { %p3297_p8 = pnand %p3296_p11, %p2681_p6 }
 0xe5a   : > { %p3298_p7 = pneg %p3297_p8 }
 0xe5c   : > { %p3305_p10 = pnand %p3304_p3, %p3298_p7 }
 0xe5e   : > { %3308 = shalt.err (!%p3305_p10)
}
 0xe5f   : > { %s4499_s22 = sld [smem:[#allocation66_spill]] }
 0xe65   : > { %s3309_s4 = scalar_lea.hbm %s4499_s22, 32 }
 0xe66   : > { %p3310_p2 = scmp.ne.s32.totalorder %s4499_s22, %s3309_s4  ;;  %p3315_p0 = scmp.lt.u32.totalorder %s3309_s4, %s4499_s22 }
 0xe68   : > { %p3311_p1 = pnand %p3310_p2, %p2681_p6 }
 0xe6a   : > { %p3312_p9 = pneg %p3311_p1 }
 0xe6c   : > { %p3317_p4 = pnand %p3315_p0, %p3312_p9 }
 0xe6e   : > { %3320 = shalt.err (!%p3317_p4)
}
 0xe6f   : > { %2618 = dma.vmem_to_hbm [thread:$0]  (%p2681_p6), %s2032_s26, 32, %s4499_s22, [#allocation8]  }
 0xe70   : > { %3384 = dma.done.wait (%p2681_p6), [#allocation8], 32  }
 0xe71   : > { %3386 = vsyncadd (%p2681_p6), [#allocation8], 4294967264 }
 0xe72 PF: > { %s4500_s24 = sld [smem:[#allocation53_spill]]  ;;  %s4501_s12 = sld [smem:[#allocation50_spill]] }
 0xe73   : > { %s4502_s2 = sld [smem:[#allocation51_spill]]  ;;  %s4503_s23 = sld [smem:[#allocation54_spill]] }
 0xe78   : > { %p53_p13 = scmp.ge.s32.totalorder %s4500_s24, 4  }
 0xe7a   :  { %55 = sbr.rel (!%p53_p13) target bundleno = 38 (0x26), region = 288 }
 0xe81   :  { %2044 = vsyncpa [#allocation7], 1 }
 0xe82   :  { %2046 = vsyncpa [#allocation7 + $0x1], 1 }
 0xe83   :  { %2047 = vsyncpa [#allocation10], 1 }
 0xe84   :  { %2049 = vsyncpa [#allocation10 + $0x1], 1 }
 0xe85   :  { %2050 = vsyncpa [#allocation13], 1 }
 0xe86   :  { %2052 = vsyncpa [#allocation13 + $0x1], 1 }
 0xe87   :  { %2053 = vsyncpa [#allocation16], 1 }
 0xe88   :  { %2055 = vsyncpa [#allocation16 + $0x1], 1 }
 0xe89   :  { %2056 = vsyncpa [#allocation19], 1 }
 0xe8a   :  { %2058 = vsyncpa [#allocation19 + $0x1], 1 }
 0xe8b   :  { %2059 = vsyncpa [#allocation22], 1 }
 0xe8c   :  { %2061 = vsyncpa [#allocation22 + $0x1], 1 }
 0xe8d   :  { %2062 = vsyncpa [#allocation25], 1 }
 0xe8e   :  { %2064 = vsyncpa [#allocation25 + $0x1], 1 }
 0xe8f   :  { %2065 = vsyncpa [#allocation28], 1 }
 0xe90   :  { %2066 = vsyncpa [#allocation31], 1 }
 0xe91   :  { %2067 = vsyncpa [#allocation8], 1 }
 0xe92   :  { %2069 = vsyncpa [#allocation8 + $0x1], 1 }
 0xe93   :  { %2070 = vsyncmov [#allocation3] }
 0xe96   :  { %s2071_s18 = vpop.sfrf %2070 }
 0xe97   :  { %p2436_p6 = scmp.ne.s32.totalorder %s2071_s18, 0 }
 0xe99   :  { %2075 = shalt.err (%p2436_p6)  }

</bundles_post_ra>
